<compile_context>
chip_gen: v7x
topology: tpu7x:2x2x1
jax: 0.10.0
libtpu: 0.0.40
codegen_flags: <defaults>
</compile_context>

<pallas_src>
import math

import jax
import jax.numpy as jnp
from jax import lax
from jax.experimental import pallas as pl
from jax.experimental.pallas import tpu as pltpu


# ---------------------------------------------------------------------------
# Fused kernel: conv1x1 -> (raw reshape) -> MHA -> residual -> LayerNorm
# ---------------------------------------------------------------------------
def _build_fused_kernel(B, C, S, E, num_heads):
    nh = num_heads
    hd = E // nh
    G = S // E          # E-wide column blocks of the conv output covering the full sequence

    def kernel(x_ref, wc_ref, bc_ref, wkvi_ref, bkvi_ref, wq_ref, bq_ref,
               wo_ref, bo_ref, lnw_ref, lnb_ref, o_ref, kvi_scr, o_scr):
        # ---- 1x1 conv: (E, C) @ (C, S) -> (E, S) f32, sequence on lanes ----
        y = jnp.dot(wc_ref[...], x_ref[0],
                    preferred_element_type=jnp.float32) + bc_ref[...]            # (E, S)

        # ---- PyTorch raw reshape (E, S) -> (S, E), realized in block-permuted row order ----
        # kernel row p = g*E + r  <->  natural sequence row s = r*G + g (undone in wrapper).
        # Unmasked self-attention + residual + LayerNorm are row-permutation equivariant,
        # so the permutation only affects the tiny wrapper-side unshuffle.
        seq = jnp.concatenate([y[:, g * E:(g + 1) * E] for g in range(G)], axis=0)  # (S, E) f32

        # ---- packed K / V / residual projection, feature-major (single A @ B^T matmul) ----
        # wkvi = [Wk; Wv; I_E]  ->  rows 0:E = K^T, E:2E = V^T, 2E:3E = seq^T (the residual).
        kvi = lax.dot_general(wkvi_ref[...], seq, (((1,), (1,)), ((), ())),
                              preferred_element_type=jnp.float32) + bkvi_ref[...]   # (3E, S)
        kvi_scr[...] = kvi

        seq_b = seq.astype(jnp.bfloat16)

        # ---- attention, one head at a time (bounds the live (S, S) f32 score slab) ----
        # TODO(synk): for large S switch to a flash-style KV-tile loop with running max/sum;
        # at S=256 one (S, S) f32 score block per head fits VMEM comfortably on v5e/v6e/v7x.
        def head_body(h, carry):
            offk = pl.multiple_of(h * hd, hd)
            offv = pl.multiple_of(E + h * hd, hd)

            # Q for this head, sequence-major (keeps the score matmul in canonical A@B form);
            # 1/sqrt(hd) is already folded into wq / bq.
            q_h = lax.dot_general(seq_b, wq_ref[h], (((1,), (1,)), ((), ())),
                                  preferred_element_type=jnp.float32) + bq_ref[h]   # (S, hd)

            k_t = kvi_scr[pl.ds(offk, hd), :].astype(jnp.bfloat16)                  # (hd, S)
            v_t = kvi_scr[pl.ds(offv, hd), :].astype(jnp.bfloat16)                  # (hd, S)

            # scores[q, k]: q on sublanes, k on lanes -> softmax reduces over lanes.
            s = lax.dot_general(q_h.astype(jnp.bfloat16), k_t,
                                (((1,), (0,)), ((), ())),
                                preferred_element_type=jnp.float32)                 # (S, S)
            m = jnp.max(s, axis=-1, keepdims=True)                                  # (S, 1)
            p = jnp.exp(s - m)
            l = jnp.sum(p, axis=-1, keepdims=True)                                  # (S, 1)
            p = (p * (1.0 / l)).astype(jnp.bfloat16)     # exact softmax normalization

            # O^T = V^T @ P^T (A @ B^T): (hd, S_k) x (S_q, S_k) -> (hd, S_q), feature-major.
            o_t = lax.dot_general(v_t, p, (((1,), (1,)), ((), ())),
                                  preferred_element_type=jnp.float32)               # (hd, S)
            o_scr[pl.ds(offk, hd), :] = o_t
            return carry

        lax.fori_loop(0, nh, head_body, 0)

        # ---- output projection (single K=E contraction) + residual + LayerNorm ----
        proj_t = jnp.dot(wo_ref[...], o_scr[...],
                         preferred_element_type=jnp.float32) + bo_ref[...]          # (E, S)
        res_t = kvi_scr[pl.ds(2 * E, E), :]                                         # (E, S)
        y_t = proj_t + res_t

        # LayerNorm over features (sublanes); stats via (1,E)x(E,S) matvecs on the idle MXU
        # to avoid cross-sublane reductions; element-wise math stays 256-lane dense.
        ones_row = jnp.ones((1, E), dtype=jnp.float32)
        mean = jnp.dot(ones_row, y_t,
                       preferred_element_type=jnp.float32) * (1.0 / E)              # (1, S)
        cent = y_t - mean
        var = jnp.dot(ones_row, cent * cent,
                      preferred_element_type=jnp.float32) * (1.0 / E)               # (1, S)
        y_n = cent * lax.rsqrt(var + 1e-5)

        # Lane-dense store: (E, S) with the sequence on lanes.
        o_ref[0] = y_n * lnw_ref[...] + lnb_ref[...]

    flops = B * (2 * E * C * S          # conv
                 + 2 * 3 * E * E * S    # packed K/V/residual projection
                 + 2 * E * E * S        # per-head Q projections
                 + 4 * E * S * S        # scores + PV
                 + 2 * E * E * S        # out projection
                 + 4 * E * S)           # LN stat matvecs
    param_bytes = 4 * (E * C + E + 3 * E * E + 3 * E + E * E + 3 * E) + 2 * (E * E + E)
    cost = pl.CostEstimate(
        flops=int(flops),
        transcendentals=int(B * nh * S * S),
        bytes_accessed=int(4 * B * C * S + 4 * B * E * S + param_bytes),
    )

    return pl.pallas_call(
        kernel,
        out_shape=jax.ShapeDtypeStruct((B, E, S), jnp.float32),
        grid=(B,),
        in_specs=[
            pl.BlockSpec((1, C, S), lambda b: (b, 0, 0)),        # x (B, C, S)
            pl.BlockSpec((E, C), lambda b: (0, 0)),              # conv weight
            pl.BlockSpec((E, 1), lambda b: (0, 0)),              # conv bias
            pl.BlockSpec((3 * E, E), lambda b: (0, 0)),          # [Wk; Wv; I]
            pl.BlockSpec((3 * E, 1), lambda b: (0, 0)),          # [bk; bv; 0]
            pl.BlockSpec((nh, hd, E), lambda b: (0, 0, 0)),      # Wq per head (pre-scaled)
            pl.BlockSpec((nh, 1, hd), lambda b: (0, 0, 0)),      # bq per head (pre-scaled)
            pl.BlockSpec((E, E), lambda b: (0, 0)),              # Wo
            pl.BlockSpec((E, 1), lambda b: (0, 0)),              # bo
            pl.BlockSpec((E, 1), lambda b: (0, 0)),              # ln weight
            pl.BlockSpec((E, 1), lambda b: (0, 0)),              # ln bias
        ],
        out_specs=pl.BlockSpec((1, E, S), lambda b: (b, 0, 0)),
        scratch_shapes=[
            pltpu.VMEM((3 * E, S), jnp.float32),                 # K^T / V^T / seq^T cache
            pltpu.VMEM((E, S), jnp.float32),                     # per-head attention outputs
        ],
        compiler_params=pltpu.CompilerParams(
            dimension_semantics=("parallel",)),
        cost_estimate=cost,
    )


# ---------------------------------------------------------------------------
# Forward pass (Pallas kernel + thin JAX glue reproducing PyTorch reshapes)
# ---------------------------------------------------------------------------
def attention_block_forward(x, params, num_heads):
    B, C, H, W = x.shape
    E = params["conv_w"].shape[0]
    S = H * W
    nh = num_heads
    hd = E // nh
    assert E % nh == 0
    assert S % E == 0, "fused kernel assumes H*W is a multiple of embed_dim"
    G = S // E
    scale = 1.0 / math.sqrt(hd)

    x2 = x.reshape(B, C, S).astype(jnp.float32)

    wqkv = params["in_proj_w"].astype(jnp.float32)           # (3E, E), PyTorch (out, in)
    bqkv = params["in_proj_b"].astype(jnp.float32)           # (3E,)

    # Packed K / V / identity(residual) weight for the feature-major projection.
    w_kvi = jnp.concatenate(
        [wqkv[E:2 * E], wqkv[2 * E:3 * E], jnp.eye(E, dtype=jnp.float32)], axis=0)     # (3E, E)
    b_kvi = jnp.concatenate(
        [bqkv[E:2 * E], bqkv[2 * E:3 * E],
         jnp.zeros((E,), jnp.float32)]).reshape(3 * E, 1)                              # (3E, 1)

    # Per-head Q weights / biases with 1/sqrt(hd) folded in.
    wq_heads = (wqkv[:E] * scale).reshape(nh, hd, E).astype(jnp.bfloat16)              # (nh, hd, E)
    bq_heads = (bqkv[:E] * scale).reshape(nh, 1, hd)                                   # (nh, 1, hd)

    fused = _build_fused_kernel(B, C, S, E, nh)
    y_blk = fused(
        x2,
        params["conv_w"].astype(jnp.float32),
        params["conv_b"].reshape(E, 1).astype(jnp.float32),
        w_kvi, b_kvi, wq_heads, bq_heads,
        params["out_proj_w"].astype(jnp.float32),
        params["out_proj_b"].reshape(E, 1).astype(jnp.float32),
        params["ln_w"].reshape(E, 1).astype(jnp.float32),
        params["ln_b"].reshape(E, 1).astype(jnp.float32),
    )                                        # (B, E, S) feature-major, lanes in blocked order

    # Undo the block-permuted sequence order and move back to (B, S, E):
    # kernel lane p = g*E + r  <->  natural sequence row s = r*G + g.
    y = y_blk.reshape(B, E, G, E).transpose(0, 3, 2, 1).reshape(B, S, E)

    # PyTorch: .view(B, -1, H, W).transpose(1, 3)  ->  (B, W, H, E)
    return y.reshape(B, E, H, W).transpose(0, 3, 2, 1)


# ---------------------------------------------------------------------------
# Pure-JAX reference (same math, no Pallas) for a sanity check
# ---------------------------------------------------------------------------
def reference_forward(x, params, num_heads):
    HI = lax.Precision.HIGHEST
    B, C, H, W = x.shape
    E = params["conv_w"].shape[0]
    S = H * W
    hd = E // num_heads

    conv = jnp.einsum("ec,bcs->bes", params["conv_w"], x.reshape(B, C, S),
                      precision=HI) + params["conv_b"][None, :, None]
    seq = conv.reshape(B, S, E)

    qkv = jnp.einsum("bse,fe->bsf", seq, params["in_proj_w"],
                     precision=HI) + params["in_proj_b"]
    q, k, v = jnp.split(qkv, 3, axis=-1)

    def split_heads(t):
        return t.reshape(B, S, num_heads, hd).transpose(0, 2, 1, 3)

    q, k, v = map(split_heads, (q, k, v))
    scores = jnp.einsum("bhqd,bhkd->bhqk", q, k, precision=HI) / math.sqrt(hd)
    attn = jax.nn.softmax(scores, axis=-1)
    o = jnp.einsum("bhqk,bhkd->bhqd", attn, v, precision=HI)
    o = o.transpose(0, 2, 1, 3).reshape(B, S, E)
    proj = jnp.einsum("bse,fe->bsf", o, params["out_proj_w"],
                      precision=HI) + params["out_proj_b"]
    y = proj + seq
    mean = y.mean(-1, keepdims=True)
    var = ((y - mean) ** 2).mean(-1, keepdims=True)
    yn = (y - mean) / jnp.sqrt(var + 1e-5)
    yn = yn * params["ln_w"] + params["ln_b"]
    return yn.reshape(B, E, H, W).transpose(0, 3, 2, 1)


if __name__ == "__main__":
    B, C, H, W = 2, 4, 16, 16
    E, NUM_HEADS = 32, 4

    key = jax.random.PRNGKey(0)
    keys = jax.random.split(key, 8)
    x = jax.random.normal(keys[0], (B, C, H, W), dtype=jnp.float32)

    params = {
        "conv_w": 0.1 * jax.random.normal(keys[1], (E, C), dtype=jnp.float32),
        "conv_b": 0.1 * jax.random.normal(keys[2], (E,), dtype=jnp.float32),
        "in_proj_w": 0.1 * jax.random.normal(keys[3], (3 * E, E), dtype=jnp.float32),
        "in_proj_b": 0.1 * jax.random.normal(keys[4], (3 * E,), dtype=jnp.float32),
        "out_proj_w": 0.1 * jax.random.normal(keys[5], (E, E), dtype=jnp.float32),
        "out_proj_b": 0.1 * jax.random.normal(keys[6], (E,), dtype=jnp.float32),
        "ln_w": jnp.ones((E,), dtype=jnp.float32),
        "ln_b": jnp.zeros((E,), dtype=jnp.float32),
    }

    out = jax.block_until_ready(attention_block_forward(x, params, NUM_HEADS))
    ref = jax.block_until_ready(reference_forward(x, params, NUM_HEADS))

    assert out.shape == (B, W, H, E), out.shape
    # bf16 MXU inputs (q/k/v/p) -> slightly looser tolerance than pure f32.
    assert jnp.allclose(out, ref, atol=3e-2, rtol=3e-2), (
        float(jnp.max(jnp.abs(out - ref))))

    print("KERNEL_OK")
</pallas_src>

<mosaic_0001>
module attributes {stable_mosaic.version = 11 : i64} {
  func.func @kernel(%arg0: i32, %arg1: memref<1x4x256xf32, #tpu.memory_space<vmem>>, %arg2: memref<32x4xf32, #tpu.memory_space<vmem>>, %arg3: memref<32x1xf32, #tpu.memory_space<vmem>>, %arg4: memref<96x32xf32, #tpu.memory_space<vmem>>, %arg5: memref<96x1xf32, #tpu.memory_space<vmem>>, %arg6: memref<4x8x32xbf16, #tpu.memory_space<vmem>>, %arg7: memref<4x1x8xf32, #tpu.memory_space<vmem>>, %arg8: memref<32x32xf32, #tpu.memory_space<vmem>>, %arg9: memref<32x1xf32, #tpu.memory_space<vmem>>, %arg10: memref<32x1xf32, #tpu.memory_space<vmem>>, %arg11: memref<32x1xf32, #tpu.memory_space<vmem>>, %arg12: memref<1x32x256xf32, #tpu.memory_space<vmem>>, %arg13: memref<96x256xf32, #tpu.memory_space<vmem>>, %arg14: memref<32x256xf32, #tpu.memory_space<vmem>>) attributes {dimension_semantics = [#tpu.dimension_semantics<parallel>], iteration_bounds = array<i64: 2>, scalar_prefetch = 0 : i64, scratch_operands = 2 : i64, tpu.core_type = #tpu.core_type<tc>, window_params = [{transform_indices = @transform_0, window_bounds = array<i64: 1, 4, 256>}, {pipeline_mode = #tpu.pipeline_mode<synchronous>, transform_indices = @transform_1, window_bounds = array<i64: 32, 4>}, {pipeline_mode = #tpu.pipeline_mode<synchronous>, transform_indices = @transform_2, window_bounds = array<i64: 32, 1>}, {pipeline_mode = #tpu.pipeline_mode<synchronous>, transform_indices = @transform_3, window_bounds = array<i64: 96, 32>}, {pipeline_mode = #tpu.pipeline_mode<synchronous>, transform_indices = @transform_4, window_bounds = array<i64: 96, 1>}, {pipeline_mode = #tpu.pipeline_mode<synchronous>, transform_indices = @transform_5, window_bounds = array<i64: 4, 8, 32>}, {pipeline_mode = #tpu.pipeline_mode<synchronous>, transform_indices = @transform_6, window_bounds = array<i64: 4, 1, 8>}, {pipeline_mode = #tpu.pipeline_mode<synchronous>, transform_indices = @transform_7, window_bounds = array<i64: 32, 32>}, {pipeline_mode = #tpu.pipeline_mode<synchronous>, transform_indices = @transform_8, window_bounds = array<i64: 32, 1>}, {pipeline_mode = #tpu.pipeline_mode<synchronous>, transform_indices = @transform_9, window_bounds = array<i64: 32, 1>}, {pipeline_mode = #tpu.pipeline_mode<synchronous>, transform_indices = @transform_10, window_bounds = array<i64: 32, 1>}, {transform_indices = @transform_11, window_bounds = array<i64: 1, 32, 256>}]} {
    %c0 = arith.constant 0 : index
    %c0_0 = arith.constant 0 : index
    %0 = vector.load %arg2[%c0, %c0_0] : memref<32x4xf32, #tpu.memory_space<vmem>>, vector<32x4xf32>
    %c0_1 = arith.constant 0 : index
    %c0_2 = arith.constant 0 : index
    %c0_3 = arith.constant 0 : index
    %1 = vector.load %arg1[%c0_1, %c0_2, %c0_3] : memref<1x4x256xf32, #tpu.memory_space<vmem>>, vector<1x4x256xf32>
    %2 = vector.shape_cast %1 : vector<1x4x256xf32> to vector<4x256xf32>
    %cst = arith.constant dense<0.000000e+00> : vector<32x256xf32>
    %3 = tpu.matmul %0, %2, %cst {dimension_numbers = #tpu.dot_dimension_numbers<[1], [0], [0], [1], [0, 0, 1, 1], [], []>} : vector<32x4xf32>, vector<4x256xf32>, vector<32x256xf32> -> vector<32x256xf32>
    %c0_4 = arith.constant 0 : index
    %c0_5 = arith.constant 0 : index
    %4 = vector.load %arg3[%c0_4, %c0_5] : memref<32x1xf32, #tpu.memory_space<vmem>>, vector<32x1xf32>
    %5 = vector.broadcast %4 : vector<32x1xf32> to vector<32x256xf32>
    %6 = arith.addf %3, %5 : vector<32x256xf32>
    %7 = vector.extract_strided_slice %6 {offsets = [0, 0], sizes = [32, 32], strides = [1, 1]} : vector<32x256xf32> to vector<32x32xf32>
    %8 = vector.extract_strided_slice %6 {offsets = [0, 32], sizes = [32, 32], strides = [1, 1]} : vector<32x256xf32> to vector<32x32xf32>
    %9 = vector.extract_strided_slice %6 {offsets = [0, 64], sizes = [32, 32], strides = [1, 1]} : vector<32x256xf32> to vector<32x32xf32>
    %10 = vector.extract_strided_slice %6 {offsets = [0, 96], sizes = [32, 32], strides = [1, 1]} : vector<32x256xf32> to vector<32x32xf32>
    %11 = vector.extract_strided_slice %6 {offsets = [0, 128], sizes = [32, 32], strides = [1, 1]} : vector<32x256xf32> to vector<32x32xf32>
    %12 = vector.extract_strided_slice %6 {offsets = [0, 160], sizes = [32, 32], strides = [1, 1]} : vector<32x256xf32> to vector<32x32xf32>
    %13 = vector.extract_strided_slice %6 {offsets = [0, 192], sizes = [32, 32], strides = [1, 1]} : vector<32x256xf32> to vector<32x32xf32>
    %14 = vector.extract_strided_slice %6 {offsets = [0, 224], sizes = [32, 32], strides = [1, 1]} : vector<32x256xf32> to vector<32x32xf32>
    %15 = tpu.concatenate %7, %8, %9, %10, %11, %12, %13, %14 in 0 : vector<32x32xf32>, vector<32x32xf32>, vector<32x32xf32>, vector<32x32xf32>, vector<32x32xf32>, vector<32x32xf32>, vector<32x32xf32>, vector<32x32xf32> -> vector<256x32xf32>
    %c0_6 = arith.constant 0 : index
    %c0_7 = arith.constant 0 : index
    %16 = vector.load %arg4[%c0_6, %c0_7] : memref<96x32xf32, #tpu.memory_space<vmem>>, vector<96x32xf32>
    %cst_8 = arith.constant dense<0.000000e+00> : vector<96x256xf32>
    %17 = tpu.matmul %16, %15, %cst_8 {dimension_numbers = #tpu.dot_dimension_numbers<[1], [1], [0], [0], [0, 0, 1, 0], [], []>} : vector<96x32xf32>, vector<256x32xf32>, vector<96x256xf32> -> vector<96x256xf32>
    %c0_9 = arith.constant 0 : index
    %c0_10 = arith.constant 0 : index
    %18 = vector.load %arg5[%c0_9, %c0_10] : memref<96x1xf32, #tpu.memory_space<vmem>>, vector<96x1xf32>
    %19 = vector.broadcast %18 : vector<96x1xf32> to vector<96x256xf32>
    %20 = arith.addf %17, %19 : vector<96x256xf32>
    %c0_11 = arith.constant 0 : index
    %c0_12 = arith.constant 0 : index
    %21 = vector.load %arg13[%c0_11, %c0_12] : memref<96x256xf32, #tpu.memory_space<vmem>>, vector<96x256xf32>
    tpu.vector_store %arg13[%c0_11, %c0_12], %20 {strides = array<i32>} : memref<96x256xf32, #tpu.memory_space<vmem>>, vector<96x256xf32>,
    %22 = arith.truncf %15 : vector<256x32xf32> to vector<256x32xbf16>
    %c0_i32 = arith.constant 0 : i32
    %c4_i32 = arith.constant 4 : i32
    %23 = arith.addi %c0_i32, %c4_i32 : i32
    %c1_i32 = arith.constant 1 : i32
    scf.for %arg15 = %c0_i32 to %23 step %c1_i32  : i32 {
      %c8_i32 = arith.constant 8 : i32
      %56 = arith.muli %arg15, %c8_i32 : i32
      %57 = tpu.assume_multiple %56, 8 : i32
      %c8_i32_35 = arith.constant 8 : i32
      %58 = arith.muli %arg15, %c8_i32_35 : i32
      %c32_i32 = arith.constant 32 : i32
      %59 = arith.addi %c32_i32, %58 : i32
      %60 = tpu.assume_multiple %59, 8 : i32
      %61 = arith.index_cast %arg15 : i32 to index
      %c0_36 = arith.constant 0 : index
      %c0_37 = arith.constant 0 : index
      %62 = vector.load %arg6[%61, %c0_36, %c0_37] : memref<4x8x32xbf16, #tpu.memory_space<vmem>>, vector<1x8x32xbf16>
      %63 = vector.shape_cast %62 : vector<1x8x32xbf16> to vector<8x32xbf16>
      %cst_38 = arith.constant dense<0.000000e+00> : vector<256x8xf32>
      %64 = tpu.matmul %22, %63, %cst_38 {dimension_numbers = #tpu.dot_dimension_numbers<[1], [1], [0], [0], [0, 0, 1, 0], [], []>} : vector<256x32xbf16>, vector<8x32xbf16>, vector<256x8xf32> -> vector<256x8xf32>
      %65 = arith.index_cast %arg15 : i32 to index
      %c0_39 = arith.constant 0 : index
      %c0_40 = arith.constant 0 : index
      %66 = vector.load %arg7[%65, %c0_39, %c0_40] : memref<4x1x8xf32, #tpu.memory_space<vmem>>, vector<1x1x8xf32>
      %67 = vector.shape_cast %66 : vector<1x1x8xf32> to vector<1x8xf32>
      %68 = vector.broadcast %67 : vector<1x8xf32> to vector<256x8xf32>
      %69 = arith.addf %64, %68 : vector<256x8xf32>
      %70 = arith.index_cast %57 : i32 to index
      %c0_41 = arith.constant 0 : index
      %71 = vector.load %arg13[%70, %c0_41] : memref<96x256xf32, #tpu.memory_space<vmem>>, vector<8x256xf32>
      %72 = arith.truncf %71 : vector<8x256xf32> to vector<8x256xbf16>
      %73 = arith.index_cast %60 : i32 to index
      %c0_42 = arith.constant 0 : index
      %74 = vector.load %arg13[%73, %c0_42] : memref<96x256xf32, #tpu.memory_space<vmem>>, vector<8x256xf32>
      %75 = arith.truncf %74 : vector<8x256xf32> to vector<8x256xbf16>
      %76 = arith.truncf %69 : vector<256x8xf32> to vector<256x8xbf16>
      %cst_43 = arith.constant dense<0.000000e+00> : vector<256x256xf32>
      %77 = tpu.matmul %76, %72, %cst_43 {dimension_numbers = #tpu.dot_dimension_numbers<[1], [0], [0], [1], [0, 0, 1, 1], [], []>} : vector<256x8xbf16>, vector<8x256xbf16>, vector<256x256xf32> -> vector<256x256xf32>
      %cst_44 = arith.constant dense<0xFF800000> : vector<256xf32>
      %78 = vector.multi_reduction <maximumf>, %77, %cst_44 [1] : vector<256x256xf32> to vector<256xf32>
      %79 = vector.shape_cast %78 : vector<256xf32> to vector<256x1xf32>
      %80 = vector.broadcast %79 : vector<256x1xf32> to vector<256x256xf32>
      %81 = arith.subf %77, %80 : vector<256x256xf32>
      %82 = math.exp %81 : vector<256x256xf32>
      %cst_45 = arith.constant dense<0.000000e+00> : vector<256xf32>
      %83 = vector.multi_reduction <add>, %82, %cst_45 [1] : vector<256x256xf32> to vector<256xf32>
      %84 = vector.shape_cast %83 : vector<256xf32> to vector<256x1xf32>
      %cst_46 = arith.constant 1.000000e+00 : f32
      %85 = vector.broadcast %cst_46 : f32 to vector<256x1xf32>
      %86 = arith.divf %85, %84 : vector<256x1xf32>
      %87 = vector.broadcast %86 : vector<256x1xf32> to vector<256x256xf32>
      %88 = arith.mulf %82, %87 : vector<256x256xf32>
      %89 = arith.truncf %88 : vector<256x256xf32> to vector<256x256xbf16>
      %cst_47 = arith.constant dense<0.000000e+00> : vector<8x256xf32>
      %90 = tpu.matmul %75, %89, %cst_47 {dimension_numbers = #tpu.dot_dimension_numbers<[1], [1], [0], [0], [0, 0, 1, 0], [], []>} : vector<8x256xbf16>, vector<256x256xbf16>, vector<8x256xf32> -> vector<8x256xf32>
      %91 = arith.index_cast %57 : i32 to index
      %c0_48 = arith.constant 0 : index
      %92 = vector.load %arg14[%91, %c0_48] : memref<32x256xf32, #tpu.memory_space<vmem>>, vector<8x256xf32>
      tpu.vector_store %arg14[%91, %c0_48], %90 {strides = array<i32>} : memref<32x256xf32, #tpu.memory_space<vmem>>, vector<8x256xf32>,
    }
    %c4_i32_13 = arith.constant 4 : i32
    %c0_14 = arith.constant 0 : index
    %c0_15 = arith.constant 0 : index
    %24 = vector.load %arg8[%c0_14, %c0_15] : memref<32x32xf32, #tpu.memory_space<vmem>>, vector<32x32xf32>
    %c0_16 = arith.constant 0 : index
    %c0_17 = arith.constant 0 : index
    %25 = vector.load %arg14[%c0_16, %c0_17] : memref<32x256xf32, #tpu.memory_space<vmem>>, vector<32x256xf32>
    %cst_18 = arith.constant dense<0.000000e+00> : vector<32x256xf32>
    %26 = tpu.matmul %24, %25, %cst_18 {dimension_numbers = #tpu.dot_dimension_numbers<[1], [0], [0], [1], [0, 0, 1, 1], [], []>} : vector<32x32xf32>, vector<32x256xf32>, vector<32x256xf32> -> vector<32x256xf32>
    %c0_19 = arith.constant 0 : index
    %c0_20 = arith.constant 0 : index
    %27 = vector.load %arg9[%c0_19, %c0_20] : memref<32x1xf32, #tpu.memory_space<vmem>>, vector<32x1xf32>
    %28 = vector.broadcast %27 : vector<32x1xf32> to vector<32x256xf32>
    %29 = arith.addf %26, %28 : vector<32x256xf32>
    %c64 = arith.constant 64 : index
    %c0_21 = arith.constant 0 : index
    %30 = vector.load %arg13[%c64, %c0_21] : memref<96x256xf32, #tpu.memory_space<vmem>>, vector<32x256xf32>
    %31 = arith.addf %29, %30 : vector<32x256xf32>
    %cst_22 = arith.constant 1.000000e+00 : f32
    %32 = vector.broadcast %cst_22 : f32 to vector<1x32xf32>
    %cst_23 = arith.constant dense<0.000000e+00> : vector<1x256xf32>
    %33 = tpu.matmul %32, %31, %cst_23 {dimension_numbers = #tpu.dot_dimension_numbers<[1], [0], [0], [1], [0, 0, 1, 1], [], []>} : vector<1x32xf32>, vector<32x256xf32>, vector<1x256xf32> -> vector<1x256xf32>
    %cst_24 = arith.constant 3.125000e-02 : f32
    %34 = vector.broadcast %cst_24 : f32 to vector<1x256xf32>
    %35 = arith.mulf %33, %34 : vector<1x256xf32>
    %36 = vector.broadcast %35 : vector<1x256xf32> to vector<32x256xf32>
    %37 = arith.subf %31, %36 : vector<32x256xf32>
    %38 = arith.mulf %37, %37 : vector<32x256xf32>
    %cst_25 = arith.constant dense<0.000000e+00> : vector<1x256xf32>
    %39 = tpu.matmul %32, %38, %cst_25 {dimension_numbers = #tpu.dot_dimension_numbers<[1], [0], [0], [1], [0, 0, 1, 1], [], []>} : vector<1x32xf32>, vector<32x256xf32>, vector<1x256xf32> -> vector<1x256xf32>
    %cst_26 = arith.constant 3.125000e-02 : f32
    %40 = vector.broadcast %cst_26 : f32 to vector<1x256xf32>
    %41 = arith.mulf %39, %40 : vector<1x256xf32>
    %cst_27 = arith.constant 9.99999974E-6 : f32
    %42 = vector.broadcast %cst_27 : f32 to vector<1x256xf32>
    %43 = arith.addf %41, %42 : vector<1x256xf32>
    %44 = math.rsqrt %43 : vector<1x256xf32>
    %45 = vector.broadcast %44 : vector<1x256xf32> to vector<32x256xf32>
    %46 = arith.mulf %37, %45 : vector<32x256xf32>
    %c0_28 = arith.constant 0 : index
    %c0_29 = arith.constant 0 : index
    %47 = vector.load %arg10[%c0_28, %c0_29] : memref<32x1xf32, #tpu.memory_space<vmem>>, vector<32x1xf32>
    %48 = vector.broadcast %47 : vector<32x1xf32> to vector<32x256xf32>
    %49 = arith.mulf %46, %48 : vector<32x256xf32>
    %c0_30 = arith.constant 0 : index
    %c0_31 = arith.constant 0 : index
    %50 = vector.load %arg11[%c0_30, %c0_31] : memref<32x1xf32, #tpu.memory_space<vmem>>, vector<32x1xf32>
    %51 = vector.broadcast %50 : vector<32x1xf32> to vector<32x256xf32>
    %52 = arith.addf %49, %51 : vector<32x256xf32>
    %c0_32 = arith.constant 0 : index
    %c0_33 = arith.constant 0 : index
    %c0_34 = arith.constant 0 : index
    %53 = vector.load %arg12[%c0_32, %c0_33, %c0_34] : memref<1x32x256xf32, #tpu.memory_space<vmem>>, vector<1x32x256xf32>
    %54 = vector.shape_cast %53 : vector<1x32x256xf32> to vector<32x256xf32>
    %55 = vector.shape_cast %52 : vector<32x256xf32> to vector<1x32x256xf32>
    tpu.vector_store %arg12[%c0_32, %c0_33, %c0_34], %55 {strides = array<i32>} : memref<1x32x256xf32, #tpu.memory_space<vmem>>, vector<1x32x256xf32>,
    return
  }
  func.func @transform_0(%arg0: i32) -> (i32, i32, i32) {
    %c0_i32 = arith.constant 0 : i32
    %c0_i32_0 = arith.constant 0 : i32
    %c0_i32_1 = arith.constant 0 : i32
    return %arg0, %c0_i32, %c0_i32_0 : i32, i32, i32
  }
  func.func @transform_1(%arg0: i32) -> (i32, i32) {
    %c0_i32 = arith.constant 0 : i32
    %c0_i32_0 = arith.constant 0 : i32
    %c0_i32_1 = arith.constant 0 : i32
    return %c0_i32, %c0_i32_0 : i32, i32
  }
  func.func @transform_2(%arg0: i32) -> (i32, i32) {
    %c0_i32 = arith.constant 0 : i32
    %c0_i32_0 = arith.constant 0 : i32
    %c0_i32_1 = arith.constant 0 : i32
    return %c0_i32, %c0_i32_0 : i32, i32
  }
  func.func @transform_3(%arg0: i32) -> (i32, i32) {
    %c0_i32 = arith.constant 0 : i32
    %c0_i32_0 = arith.constant 0 : i32
    %c0_i32_1 = arith.constant 0 : i32
    return %c0_i32, %c0_i32_0 : i32, i32
  }
  func.func @transform_4(%arg0: i32) -> (i32, i32) {
    %c0_i32 = arith.constant 0 : i32
    %c0_i32_0 = arith.constant 0 : i32
    %c0_i32_1 = arith.constant 0 : i32
    return %c0_i32, %c0_i32_0 : i32, i32
  }
  func.func @transform_5(%arg0: i32) -> (i32, i32, i32) {
    %c0_i32 = arith.constant 0 : i32
    %c0_i32_0 = arith.constant 0 : i32
    %c0_i32_1 = arith.constant 0 : i32
    %c0_i32_2 = arith.constant 0 : i32
    return %c0_i32, %c0_i32_0, %c0_i32_1 : i32, i32, i32
  }
  func.func @transform_6(%arg0: i32) -> (i32, i32, i32) {
    %c0_i32 = arith.constant 0 : i32
    %c0_i32_0 = arith.constant 0 : i32
    %c0_i32_1 = arith.constant 0 : i32
    %c0_i32_2 = arith.constant 0 : i32
    return %c0_i32, %c0_i32_0, %c0_i32_1 : i32, i32, i32
  }
  func.func @transform_7(%arg0: i32) -> (i32, i32) {
    %c0_i32 = arith.constant 0 : i32
    %c0_i32_0 = arith.constant 0 : i32
    %c0_i32_1 = arith.constant 0 : i32
    return %c0_i32, %c0_i32_0 : i32, i32
  }
  func.func @transform_8(%arg0: i32) -> (i32, i32) {
    %c0_i32 = arith.constant 0 : i32
    %c0_i32_0 = arith.constant 0 : i32
    %c0_i32_1 = arith.constant 0 : i32
    return %c0_i32, %c0_i32_0 : i32, i32
  }
  func.func @transform_9(%arg0: i32) -> (i32, i32) {
    %c0_i32 = arith.constant 0 : i32
    %c0_i32_0 = arith.constant 0 : i32
    %c0_i32_1 = arith.constant 0 : i32
    return %c0_i32, %c0_i32_0 : i32, i32
  }
  func.func @transform_10(%arg0: i32) -> (i32, i32) {
    %c0_i32 = arith.constant 0 : i32
    %c0_i32_0 = arith.constant 0 : i32
    %c0_i32_1 = arith.constant 0 : i32
    return %c0_i32, %c0_i32_0 : i32, i32
  }
  func.func @transform_11(%arg0: i32) -> (i32, i32, i32) {
    %c0_i32 = arith.constant 0 : i32
    %c0_i32_0 = arith.constant 0 : i32
    %c0_i32_1 = arith.constant 0 : i32
    return %arg0, %c0_i32, %c0_i32_0 : i32, i32, i32
  }
}

</mosaic_0001>

<bundles_post_ra>
// kernel: tpu_custom_call.1
= control target key start
LH: loop header
LB: loop body
LE: loop exit
PB: predicated region body
PF: predicated region fallthrough
CT: control target
= control target key end

     0   :  { %16 = vsyncpa [#allocation5], 0  ;;  %s4471_s0 = inlined_call_operand.vmem [shape: f32[2,4,256], index: 0, kind: input, shape index: {}]   ;;  %s4472_s1 = inlined_call_operand.vmem [shape: f32[32,4], index: 1, kind: input, shape index: {}]   ;;  %s4473_s2 = inlined_call_operand.vmem [shape: f32[32,1], index: 2, kind: input, shape index: {}]   ;;  %s4474_s3 = inlined_call_operand.vmem [shape: f32[96,32], index: 3, kind: input, shape index: {}]   ;;  %s4475_s4 = inlined_call_operand.vmem [shape: f32[96,1], index: 4, kind: input, shape index: {}]   ;;  %s4476_s5 = inlined_call_operand.vmem [shape: bf16[4,8,32], index: 5, kind: input, shape index: {}]   ;;  %s4477_s6 = inlined_call_operand.vmem [shape: f32[4,1,8], index: 6, kind: input, shape index: {}]   ;;  %s4478_s7 = inlined_call_operand.vmem [shape: f32[32,32], index: 7, kind: input, shape index: {}]   ;;  %s4479_s8 = inlined_call_operand.vmem [shape: f32[32,1], index: 8, kind: input, shape index: {}]   ;;  %s4480_s9 = inlined_call_operand.vmem [shape: f32[32,1], index: 9, kind: input, shape index: {}]   ;;  %s4481_s10 = inlined_call_operand.vmem [shape: f32[32,1], index: 10, kind: input, shape index: {}]   ;;  %s4482_s11 = inlined_call_operand.hbm [shape: f32[2,32,256], index: 11, kind: output, shape index: {}]  }
   0x1   :  { %18 = vsyncpa [#allocation5 + $0x1], 0  ;;  %s3345_s17 = smov 0   ;;  %s3347_s18 = smov 0  }
   0x2   :  { %s3349_s19 = smov 0   ;;  %s3351_s20 = smov 0  }
   0x3 LB: > { %4532 = sst [smem:[#allocation7_spill]] %s3265_s19  ;;  %s3366_s21 = sadd.s32 4294967295, %s3269_s20   ;;  %s3269_s20 = sphi %s3351_s20, %s4640_s20   ;;  %s3265_s19 = sphi %s3349_s19, %s4639_s19   ;;  %s3261_s18 = sphi %s3347_s18, %s4638_s18   ;;  %s3257_s17 = sphi %s3345_s17, %s4637_s17  }
   0x4   : > { %s2576_s22 = sadd.s32 4294967294, %s3269_s20   ;;  %s3370_s23 = sadd.s32 1, %s3269_s20  }
   0x5   : > { %s267_s24 = sadd.s32 1, %s3265_s19  ;;  %s264_s25 = ssub.s32 %s3269_s20, %s3370_s23 }
   0x6   : > { %p277_p0 = scmp.ne.s32.totalorder %s3265_s19, %s3261_s18  ;;  %p265_p1 = scmp.eq.s32.totalorder %s264_s25, 0 }
   0x7   : > { %p278_p2 = scmp.eq.s32.totalorder %s3366_s21, 1  ;;  %p283_p3 = scmp.ne.s32.totalorder %s3261_s18, %s3257_s17 }
   0x8   : > { %p284_p4 = scmp.eq.s32.totalorder %s2576_s22, 1  ;;  %p2579_p7 = scmp.ge.s32.totalorder %s3269_s20, 1 }
   0x9   : > { %s3381_s26 = scalar_select %p265_p1, %s3265_s19, %s267_s24  }
   0xa   : > { %p3383_p5 = por %p278_p2, %p277_p0  ;;  %p3387_p6 = por %p284_p4, %p283_p3 }
   0xb   : > { %4533 = sst [smem:[#allocation8_spill]] %s3381_s26  ;;  %p340_p8 = scmp.lt.s32.totalorder %s3269_s20, 3 }
   0xd   : > { %p341_p9 = pnand %p2579_p7, %p340_p8 }
   0xf   : > { %344 = sbr.rel (%p341_p9) target bundleno = 2573 (0xa0d), region = 64 }
  0x16   : > { %s4483_s29 = sand.u32 1, %s3261_s18   ;;  %p380_p10 = scmp.lt.s32.totalorder %s3366_s21, 1  ;;  %v4487_v0 = vmov 0.0   ;;  %v4485_v1 = vmov 0   ;;  %v391_v2 = vld [vmem:[%s4473_s2] sm:$0xff]  ;;  %v393_v3 = vld [vmem:[%s4473_s2 + $0x10] sm:$0xff] }
  0x17   : > { %s3397_s30 = sshll.u32 %s4483_s29, 6  ;;  %499 = vmatprep.mubr.f32.mxu0 %v4487_v0  ;;  %2942 = vset.pattern.permute.xlu0 %v4485_v1  ;;  %v392_v4 = vld [vmem:[%s4473_s2 + $0x8] sm:$0xff]  ;;  %v394_v5 = vld [vmem:[%s4473_s2 + $0x18] sm:$0xff]  ;;  %vm430_vm0 = vcmask 1043456   ;;  %v386_v8 = vld [vmem:[%s4472_s1] sm:$0xff]  ;;  %vm417_vm1 = vcmask 31744  }
  0x18   : > { %2943 = vset.pattern.permute.xlu1 %v4485_v1  ;;  %s381_s16 = scalar_select %p380_p10, %s3366_s21, 1  ;;  %397 = vperm.xlu0 %2942, %v391_v2   ;;  %v387_v9 = vld [vmem:[%s4472_s1 + $0x8] sm:$0xff]  ;;  %v388_v10 = vld [vmem:[%s4472_s1 + $0x10] sm:$0xff]  ;;  %v389_v11 = vld [vmem:[%s4472_s1 + $0x18] sm:$0xff]  ;;  %vm688_vm2 = vcmask 261120  }
  0x19   : > { %407 = vperm.xlu1 %2943, %v393_v3   ;;  %vm3439_vm3 = vmpackc.low %vm688_vm2, %vm688_vm2  ;;  %s3277_s25 = smov 96   ;;  %s3278_s12 = smov 64   ;;  %v617_v41 = vld [vmem:[%s4475_s4 + $0x8] sm:$0xff]  ;;  %v616_v42 = vld [vmem:[%s4475_s4] sm:$0xff] }
  0x1a   : > { %s2685_s26 = sshll.u32 %s381_s16, 3  ;;  %s3279_s13 = smov 32   ;;  %v619_v43 = vld [vmem:[%s4475_s4 + $0x18] sm:$0xff]  ;;  %v618_v44 = vld [vmem:[%s4475_s4 + $0x10] sm:$0xff]  ;;  %v621_v45 = vld [vmem:[%s4475_s4 + $0x28] sm:$0xff] }
  0x1b   : > { %s384_s19 = scalar_lea.vmem %s4471_s0, %s2685_s26  ;;  %v620_v46 = vld [vmem:[%s4475_s4 + $0x20] sm:$0xff]  ;;  %v3499_v48 = vld [vmem:[%s4474_s3 + $0x28] sm:$0xff]  ;;  %v623_v49 = vld [vmem:[%s4475_s4 + $0x38] sm:$0xff]  ;;  %s3676_s26 = smov 0  }
  0x1c   : > { %v390_v6 = vld [vmem:[%s384_s19] sm:$0xff]  ;;  %402 = vperm.xlu0 %2942, %v392_v4   ;;  %v622_v50 = vld [vmem:[%s4475_s4 + $0x30] sm:$0xff]  ;;  %2732 = vmatprep.mubr.msk.f32.mxu1 %vm688_vm2, %v3499_v48  ;;  %v625_v51 = vld [vmem:[%s4475_s4 + $0x48] sm:$0xff]  ;;  %s3674_s19 = scalar_lea.vmem [#allocation4], %s3397_s30 }
  0x1d   : > { %412 = vperm.xlu1 %2943, %v394_v5   ;;  %v416_v7 = vcombine.high %v390_v6, %v390_v6  ;;  %v3494_v47 = vld [vmem:[%s4474_s3] sm:$0xff]  ;;  %v627_v53 = vld [vmem:[%s4475_s4 + $0x58] sm:$0xff]  ;;  %v626_v54 = vld [vmem:[%s4475_s4 + $0x50] sm:$0xff] }
  0x1e   : > { %v624_v52 = vld [vmem:[%s4475_s4 + $0x40] sm:$0xff]  ;;  %v606_v25 = vld [vmem:[%s4474_s3 + $0x10] sm:$0xff] }
  0x1f   : > { %2583 = vmatprep.subr.msk.mxu0 %vm430_vm0, %v416_v7 }
  0x20   : > { %2584 = vmatpush1.msk.msra.mxu0 %vm430_vm0, %v390_v6 }
  0x21   : > { %2585 = vmatmul.mubr.msk.f32.vlgmr.msra.gmra.mrb[0].mxu0 %vm417_vm1, %v386_v8 }
  0x22   : > { %505 = vmatprep.mubr.f32.mxu0 %v4487_v0 }
  0x25   : > { %2586 = vmatmul.mubr.msk.f32.gmra.mrb[2].mxu0 %vm417_vm1, %v387_v9 }
  0x26   : > { %511 = vmatprep.mubr.f32.mxu0 %v4487_v0 }
  0x29   : > { %2587 = vmatmul.mubr.msk.f32.gmra.mrb[4].mxu0 %vm417_vm1, %v388_v10 }
  0x2a   : > { %517 = vmatprep.mubr.f32.mxu0 %v4487_v0 }
  0x2d   : > { %2588 = vmatmul.mubr.msk.f32.gmra.mrb[6].mxu0 %vm417_vm1, %v389_v11 }
  0x2e   : > { %2722 = vmatprep.mubr.msk.f32.mxu0 %vm688_vm2, %v3494_v47 }
  0x97   : > { %v398_v12 = vpop.permute.xlu0 %397 }
  0x98   : > { %v408_v21 = vpop.permute.xlu1 %407 }
  0x9b   : > { %v403_v15 = vpop.permute.xlu0 %402 }
  0x9c   : > { %v413_v30 = vpop.permute.xlu1 %412 }
  0xf4   : > { %v501_v13 = vpop.f32.mrb[0].mxu0 }
  0xf5   : > { %v503_v14 = vpop.f32.mrb[1].mxu0  ;;  %v502_v17 = vadd.f32 %v501_v13, %v398_v12 }
  0xf6   : > { %v504_v20 = vadd.f32 %v503_v14, %v398_v12 }
  0xf8   : > { %v507_v16 = vpop.f32.mrb[2].mxu0 }
  0xf9   : > { %v508_v18 = vadd.f32 %v507_v16, %v403_v15  ;;  %v509_v19 = vpop.f32.mrb[3].mxu0 }
  0xfa   : > { %v510_v22 = vadd.f32 %v509_v19, %v403_v15 }
  0xfb   : > { %v3435_v23 = vpack.c.bf16 %v508_v18, %v502_v17  ;;  %v2949_v24 = vpack.i.bf16 %v508_v18, %v502_v17 }
  0xfc   : > { %v513_v26 = vpop.f32.mrb[4].mxu0  ;;  %v2944_v27 = vpack.i.bf16 %v510_v22, %v504_v20  ;;  %v3443_v28 = vpack.c.bf16 %v510_v22, %v504_v20 }
  0xfd   : > { %4536 = vst [vmem:[#allocation9_spill] sm:$0xff] %v3435_v23  ;;  %v515_v29 = vpop.f32.mrb[5].mxu0  ;;  %2950 = vrot.lane.b32.xlu1 %v2949_v24, %s3277_s25  ;;  %v514_v32 = vadd.f32 %v513_v26, %v408_v21 }
  0xfe   : > { %4539 = vst [vmem:[#allocation10_spill] sm:$0xff] %v3443_v28  ;;  %2945 = vrot.lane.b32.xlu0 %v2944_v27, %s3277_s25  ;;  %2799 = vmatprep.subr.msk.bf16.mxu0 %vm3439_vm3, %v3443_v28  ;;  %v516_v35 = vadd.f32 %v515_v29, %v408_v21 }
  0xff   : > { %2869 = vmatprep.subr.msk.bf16.mxu1 %vm3439_vm3, %v3443_v28  ;;  %2802 = vmatpush3.bf16.xpose.msk.msra.mxu0 %vm3439_vm3, %v3435_v23 }
 0x100   : > { %2877 = vmatpush3.bf16.xpose.msk.msra.mxu1 %vm3439_vm3, %v3435_v23  ;;  %v519_v31 = vpop.f32.mrb[6].mxu0 }
 0x101   : > { %v520_v33 = vadd.f32 %v519_v31, %v413_v30  ;;  %v521_v34 = vpop.f32.mrb[7].mxu0 }
 0x102   : > { %v522_v36 = vadd.f32 %v521_v34, %v413_v30 }
 0x103   : > { %v3457_v37 = vpack.c.bf16 %v520_v33, %v514_v32  ;;  %v2959_v38 = vpack.i.bf16 %v520_v33, %v514_v32 }
 0x104   : > { %v2954_v39 = vpack.i.bf16 %v522_v36, %v516_v35  ;;  %v3459_v40 = vpack.c.bf16 %v522_v36, %v516_v35 }
 0x105   : > { %4540 = vst [vmem:[#allocation11_spill] sm:$0xff] %v3457_v37  ;;  %2960 = vrot.lane.b32.xlu1 %v2959_v38, %s3277_s25 }
 0x106   : > { %4541 = vst [vmem:[#allocation12_spill] sm:$0xff] %v3459_v40  ;;  %2955 = vrot.lane.b32.xlu0 %v2954_v39, %s3277_s25  ;;  %2805 = vmatprep.subr.msk.bf16.mxu0 %vm3439_vm3, %v3459_v40 }
 0x107   : > { %2870 = vmatprep.subr.msk.bf16.mxu1 %vm3439_vm3, %v3459_v40  ;;  %2808 = vmatpush3.bf16.xpose.msk.msra.mxu0 %vm3439_vm3, %v3457_v37 }
 0x108   : > { %2878 = vmatpush3.bf16.xpose.msk.msra.mxu1 %vm3439_vm3, %v3457_v37 }
 0x109   : > { %2970 = vrot.lane.b32.xlu1 %v2949_v24, %s3278_s12 }
 0x10a   : > { %2965 = vrot.lane.b32.xlu0 %v2944_v27, %s3278_s12 }
 0x10d   : > { %2980 = vrot.lane.b32.xlu1 %v2959_v38, %s3278_s12 }
 0x10e   : > { %2975 = vrot.lane.b32.xlu0 %v2954_v39, %s3278_s12 }
 0x111   : > { %2990 = vrot.lane.b32.xlu1 %v2949_v24, %s3279_s13 }
 0x112   : > { %2985 = vrot.lane.b32.xlu0 %v2944_v27, %s3279_s13 }
 0x115   : > { %3000 = vrot.lane.b32.xlu1 %v2959_v38, %s3279_s13 }
 0x116   : > { %2995 = vrot.lane.b32.xlu0 %v2954_v39, %s3279_s13 }
 0x119   : > { %635 = vperm.xlu1 %2943, %v617_v41  }
 0x11a   : > { %630 = vperm.xlu0 %2942, %v616_v42  }
 0x11d   : > { %645 = vperm.xlu1 %2943, %v619_v43  }
 0x11e   : > { %640 = vperm.xlu0 %2942, %v618_v44  }
 0x121   : > { %655 = vperm.xlu1 %2943, %v621_v45  }
 0x122   : > { %650 = vperm.xlu0 %2942, %v620_v46   ;;  %v605_v46 = vld [vmem:[%s4474_s3 + $0x8] sm:$0xff] }
 0x125   : > { %665 = vperm.xlu1 %2943, %v623_v49   ;;  %v610_v49 = vld [vmem:[%s4474_s3 + $0x30] sm:$0xff] }
 0x126   : > { %660 = vperm.xlu0 %2942, %v622_v50   ;;  %v611_v50 = vld [vmem:[%s4474_s3 + $0x38] sm:$0xff] }
 0x129   : > { %675 = vperm.xlu1 %2943, %v625_v51   ;;  %v608_v51 = vld [vmem:[%s4474_s3 + $0x20] sm:$0xff] }
 0x12a   : > { %670 = vperm.xlu0 %2942, %v624_v52   ;;  %v613_v52 = vld [vmem:[%s4474_s3 + $0x48] sm:$0xff] }
 0x12d   : > { %685 = vperm.xlu1 %2943, %v627_v53   ;;  %v614_v53 = vld [vmem:[%s4474_s3 + $0x50] sm:$0xff] }
 0x12e   : > { %680 = vperm.xlu0 %2942, %v626_v54   ;;  %v615_v54 = vld [vmem:[%s4474_s3 + $0x58] sm:$0xff] }
 0x16f   : > { %v2951_v55 = vpop.permute.xlu1 %2950 }
 0x170   : > { %v2953_v56 = vunpack.i.h.bf16 %v2951_v55  ;;  %v2952_v57 = vunpack.i.l.bf16 %v2951_v55  ;;  %v2946_v58 = vpop.permute.xlu0 %2945 }
 0x171   : > { %v2948_v59 = vunpack.i.h.bf16 %v2946_v58  ;;  %v2947_v60 = vunpack.i.l.bf16 %v2946_v58 }
 0x172   : > { %v3525_v62 = vpack.c.bf16 %v2953_v56, %v2952_v57 }
 0x173   : > { %v3523_v61 = vpack.c.bf16 %v2948_v59, %v2947_v60 }
 0x174   : > { %4543 = vst [vmem:[#allocation14_spill] sm:$0xff] %v3525_v62 }
 0x175   : > { %4542 = vst [vmem:[#allocation13_spill] sm:$0xff] %v3523_v61  ;;  %2811 = vmatprep.subr.msk.bf16.mxu0 %vm3439_vm3, %v3523_v61  ;;  %2871 = vmatprep.subr.msk.bf16.mxu1 %vm3439_vm3, %v3523_v61 }
 0x176   : > { %2814 = vmatpush3.bf16.xpose.msk.msra.mxu0 %vm3439_vm3, %v3525_v62  ;;  %2879 = vmatpush3.bf16.xpose.msk.msra.mxu1 %vm3439_vm3, %v3525_v62 }
 0x177   : > { %v2961_v63 = vpop.permute.xlu1 %2960 }
 0x178   : > { %v2963_v2 = vunpack.i.h.bf16 %v2961_v63  ;;  %v2962_v3 = vunpack.i.l.bf16 %v2961_v63  ;;  %v2956_v4 = vpop.permute.xlu0 %2955 }
 0x179   : > { %v2958_v5 = vunpack.i.h.bf16 %v2956_v4  ;;  %v2957_v6 = vunpack.i.l.bf16 %v2956_v4 }
 0x17a   : > { %v3541_v8 = vpack.c.bf16 %v2963_v2, %v2962_v3 }
 0x17b   : > { %v3539_v7 = vpack.c.bf16 %v2958_v5, %v2957_v6  ;;  %v2971_v10 = vpop.permute.xlu1 %2970 }
 0x17c   : > { %4545 = vst [vmem:[#allocation16_spill] sm:$0xff] %v3541_v8  ;;  %v2966_v9 = vpop.permute.xlu0 %2965  ;;  %v2973_v14 = vunpack.i.h.bf16 %v2971_v10  ;;  %v2972_v15 = vunpack.i.l.bf16 %v2971_v10 }
 0x17d   : > { %4544 = vst [vmem:[#allocation15_spill] sm:$0xff] %v3539_v7  ;;  %v2968_v11 = vunpack.i.h.bf16 %v2966_v9  ;;  %v2967_v12 = vunpack.i.l.bf16 %v2966_v9  ;;  %2817 = vmatprep.subr.msk.bf16.mxu0 %vm3439_vm3, %v3539_v7  ;;  %2872 = vmatprep.subr.msk.bf16.mxu1 %vm3439_vm3, %v3539_v7 }
 0x17e   : > { %2820 = vmatpush3.bf16.xpose.msk.msra.mxu0 %vm3439_vm3, %v3541_v8  ;;  %2880 = vmatpush3.bf16.xpose.msk.msra.mxu1 %vm3439_vm3, %v3541_v8  ;;  %v3563_v19 = vpack.c.bf16 %v2973_v14, %v2972_v15 }
 0x17f   : > { %v3555_v13 = vpack.c.bf16 %v2968_v11, %v2967_v12  ;;  %v2981_v20 = vpop.permute.xlu1 %2980 }
 0x180   : > { %v2976_v16 = vpop.permute.xlu0 %2975  ;;  %4547 = vst [vmem:[#allocation18_spill] sm:$0xff] %v3563_v19  ;;  %v2983_v24 = vunpack.i.h.bf16 %v2981_v20  ;;  %v2982_v26 = vunpack.i.l.bf16 %v2981_v20 }
 0x181   : > { %4546 = vst [vmem:[#allocation17_spill] sm:$0xff] %v3555_v13  ;;  %v2978_v17 = vunpack.i.h.bf16 %v2976_v16  ;;  %v2977_v18 = vunpack.i.l.bf16 %v2976_v16  ;;  %2823 = vmatprep.subr.msk.bf16.mxu0 %vm3439_vm3, %v3555_v13  ;;  %2873 = vmatprep.subr.msk.bf16.mxu1 %vm3439_vm3, %v3555_v13 }
 0x182   : > { %v3579_v30 = vpack.c.bf16 %v2983_v24, %v2982_v26 }
 0x183   : > { %v3565_v21 = vpack.c.bf16 %v2978_v17, %v2977_v18  ;;  %v2991_v31 = vpop.permute.xlu1 %2990 }
 0x184   : > { %v2986_v22 = vpop.permute.xlu0 %2985  ;;  %4549 = vst [vmem:[#allocation20_spill] sm:$0xff] %v3579_v30  ;;  %v2993_v34 = vunpack.i.h.bf16 %v2991_v31  ;;  %v2992_v35 = vunpack.i.l.bf16 %v2991_v31 }
 0x185   : > { %4548 = vst [vmem:[#allocation19_spill] sm:$0xff] %v3565_v21  ;;  %v2988_v27 = vunpack.i.h.bf16 %v2986_v22  ;;  %v2987_v29 = vunpack.i.l.bf16 %v2986_v22 }
 0x186   : > { %2826 = vmatpush3.bf16.xpose.msk.msra.mxu0 %vm3439_vm3, %v3563_v19  ;;  %2881 = vmatpush3.bf16.xpose.msk.msra.mxu1 %vm3439_vm3, %v3563_v19  ;;  %v3595_v39 = vpack.c.bf16 %v2993_v34, %v2992_v35 }
 0x187   : > { %2829 = vmatprep.subr.msk.bf16.mxu0 %vm3439_vm3, %v3565_v21  ;;  %2874 = vmatprep.subr.msk.bf16.mxu1 %vm3439_vm3, %v3565_v21  ;;  %v3581_v32 = vpack.c.bf16 %v2988_v27, %v2987_v29  ;;  %v3001_v41 = vpop.permute.xlu1 %3000 }
 0x188   : > { %v2996_v33 = vpop.permute.xlu0 %2995  ;;  %4551 = vst [vmem:[#allocation22_spill] sm:$0xff] %v3595_v39  ;;  %v3003_v43 = vunpack.i.h.bf16 %v3001_v41  ;;  %v3002_v44 = vunpack.i.l.bf16 %v3001_v41 }
 0x189   : > { %4550 = vst [vmem:[#allocation21_spill] sm:$0xff] %v3581_v32  ;;  %v2998_v36 = vunpack.i.h.bf16 %v2996_v33  ;;  %v2997_v38 = vunpack.i.l.bf16 %v2996_v33 }
 0x18a   : > { %v3611_v45 = vpack.c.bf16 %v3003_v43, %v3002_v44 }
 0x18b   : > { %v3597_v42 = vpack.c.bf16 %v2998_v36, %v2997_v38 }
 0x18c   : > { %4553 = vst [vmem:[#allocation24_spill] sm:$0xff] %v3611_v45 }
 0x18d   : > { %4552 = vst [vmem:[#allocation23_spill] sm:$0xff] %v3597_v42 }
 0x18e   : > { %2832 = vmatpush3.bf16.xpose.msk.msra.mxu0 %vm3439_vm3, %v3579_v30  ;;  %2882 = vmatpush3.bf16.xpose.msk.msra.mxu1 %vm3439_vm3, %v3579_v30 }
 0x18f   : > { %2835 = vmatprep.subr.msk.bf16.mxu0 %vm3439_vm3, %v3581_v32  ;;  %2875 = vmatprep.subr.msk.bf16.mxu1 %vm3439_vm3, %v3581_v32 }
 0x196   : > { %2838 = vmatpush3.bf16.xpose.msk.msra.mxu0 %vm3439_vm3, %v3595_v39  ;;  %2883 = vmatpush3.bf16.xpose.msk.msra.mxu1 %vm3439_vm3, %v3595_v39 }
 0x197   : > { %2841 = vmatprep.subr.msk.bf16.mxu0 %vm3439_vm3, %v3597_v42  ;;  %2876 = vmatprep.subr.msk.bf16.mxu1 %vm3439_vm3, %v3597_v42 }
 0x198   : > { %v636_v56 = vpop.permute.xlu1 %635 }
 0x199   : > { %v631_v55 = vpop.permute.xlu0 %630 }
 0x19c   : > { %v646_v58 = vpop.permute.xlu1 %645 }
 0x19d   : > { %v641_v57 = vpop.permute.xlu0 %640 }
 0x19e   : > { %2844 = vmatpush3.bf16.xpose.msk.msra.mxu0 %vm3439_vm3, %v3611_v45  ;;  %2884 = vmatpush3.bf16.xpose.msk.msra.mxu1 %vm3439_vm3, %v3611_v45 }
 0x1a0   : > { %v656_v60 = vpop.permute.xlu1 %655 }
 0x1a1   : > { %v651_v59 = vpop.permute.xlu0 %650 }
 0x1a4   : > { %v666_v24 = vpop.permute.xlu1 %665 }
 0x1a5   : > { %2723 = vmatmul.mubr.msk.f32.vlgmr.msra.gmra.mrb[8].mxu0 %vm688_vm2, %v3494_v47  ;;  %2733 = vmatmul.mubr.msk.f32.vlgmr.msra.gmra.mrb[0].mxu1 %vm688_vm2, %v3499_v48  ;;  %v607_v47 = vld [vmem:[%s4474_s3 + $0x18] sm:$0xff]  ;;  %v612_v48 = vld [vmem:[%s4474_s3 + $0x40] sm:$0xff]  ;;  %v661_v11 = vpop.permute.xlu0 %660 }
 0x1a6   : > { %2724 = vmatprep.mubr.msk.f32.mxu0 %vm688_vm2, %v605_v46  ;;  %2734 = vmatprep.mubr.msk.f32.mxu1 %vm688_vm2, %v610_v49 }
 0x1a9   : > { %2725 = vmatmul.mubr.msk.f32.gmra.mrb[10].mxu0 %vm688_vm2, %v605_v46  ;;  %2735 = vmatmul.mubr.msk.f32.gmra.mrb[2].mxu1 %vm688_vm2, %v610_v49  ;;  %v671_v38 = vpop.permute.xlu0 %670 }
 0x1aa   : > { %2726 = vmatprep.mubr.msk.f32.mxu0 %vm688_vm2, %v606_v25  ;;  %2736 = vmatprep.mubr.msk.f32.mxu1 %vm688_vm2, %v611_v50 }
 0x1ad   : > { %2727 = vmatmul.mubr.msk.f32.gmra.mrb[12].mxu0 %vm688_vm2, %v606_v25  ;;  %2737 = vmatmul.mubr.msk.f32.gmra.mrb[4].mxu1 %vm688_vm2, %v611_v50 }
 0x1ae   : > { %2728 = vmatprep.mubr.msk.f32.mxu0 %vm688_vm2, %v607_v47  ;;  %2738 = vmatprep.mubr.msk.f32.mxu1 %vm688_vm2, %v612_v48 }
 0x1b1   : > { %2729 = vmatmul.mubr.msk.f32.gmra.mrb[14].mxu0 %vm688_vm2, %v607_v47  ;;  %2739 = vmatmul.mubr.msk.f32.gmra.mrb[6].mxu1 %vm688_vm2, %v612_v48  ;;  %v676_v48 = vpop.permute.xlu1 %675 }
 0x1b2   : > { %2730 = vmatprep.mubr.msk.f32.mxu0 %vm688_vm2, %v608_v51  ;;  %2740 = vmatprep.mubr.msk.f32.mxu1 %vm688_vm2, %v613_v52 }
 0x1b5   : > { %2731 = vmatmul.mubr.msk.f32.gmra.mrb[16].mxu0 %vm688_vm2, %v608_v51  ;;  %2741 = vmatmul.mubr.msk.f32.gmra.mrb[8].mxu1 %vm688_vm2, %v613_v52 }
 0x1b6   : > { %2742 = vmatprep.mubr.msk.f32.mxu1 %vm688_vm2, %v614_v53 }
 0x1b9   : > { %2743 = vmatmul.mubr.msk.f32.gmra.mrb[10].mxu1 %vm688_vm2, %v614_v53 }
 0x1ba   : > { %2744 = vmatprep.mubr.msk.f32.mxu1 %vm688_vm2, %v615_v54 }
 0x1bd   : > { %2745 = vmatmul.mubr.msk.f32.gmra.mrb[12].mxu1 %vm688_vm2, %v615_v54 }
 0x278   : > { %v855_v63 = vpop.f32.mrb[8].mxu0  ;;  %v885_v2 = vpop.f32.mrb[0].mxu1 }
 0x279   : > { %v856_v3 = vadd.f32 %v855_v63, %v631_v55  ;;  %v886_v4 = vadd.f32 %v885_v2, %v656_v60  ;;  %v857_v5 = vpop.f32.mrb[9].mxu0  ;;  %v887_v6 = vpop.f32.mrb[1].mxu1 }
 0x27a   : > { %v858_v9 = vadd.f32 %v857_v5, %v631_v55  ;;  %v888_v10 = vadd.f32 %v887_v6, %v656_v60  ;;  %v681_v63 = vpop.permute.xlu0 %680  ;;  %v686_v5 = vpop.permute.xlu1 %685 }
 0x27b   : > { %926 = vst [vmem:[#allocation2] sm:$0xff] %v856_v3  ;;  %936 = vst [vmem:[#allocation2 + $0x50] sm:$0xff] %v886_v4 }
 0x27c   : > { %927 = vst [vmem:[#allocation2 + $0x8] sm:$0xff] %v858_v9  ;;  %937 = vst [vmem:[#allocation2 + $0x58] sm:$0xff] %v888_v10  ;;  %v861_v12 = vpop.f32.mrb[10].mxu0  ;;  %v891_v14 = vpop.f32.mrb[2].mxu1 }
 0x27d   : > { %v862_v15 = vadd.f32 %v861_v12, %v636_v56  ;;  %v892_v16 = vadd.f32 %v891_v14, %v661_v11  ;;  %v863_v17 = vpop.f32.mrb[11].mxu0  ;;  %v893_v18 = vpop.f32.mrb[3].mxu1 }
 0x27e   : > { %v864_v20 = vadd.f32 %v863_v17, %v636_v56  ;;  %v894_v22 = vadd.f32 %v893_v18, %v661_v11 }
 0x27f   : > { %928 = vst [vmem:[#allocation2 + $0x10] sm:$0xff] %v862_v15  ;;  %938 = vst [vmem:[#allocation2 + $0x60] sm:$0xff] %v892_v16 }
 0x280   : > { %929 = vst [vmem:[#allocation2 + $0x18] sm:$0xff] %v864_v20  ;;  %939 = vst [vmem:[#allocation2 + $0x68] sm:$0xff] %v894_v22  ;;  %v867_v26 = vpop.f32.mrb[12].mxu0  ;;  %v897_v27 = vpop.f32.mrb[4].mxu1 }
 0x281   : > { %v868_v29 = vadd.f32 %v867_v26, %v641_v57  ;;  %v898_v31 = vadd.f32 %v897_v27, %v666_v24  ;;  %v869_v33 = vpop.f32.mrb[13].mxu0  ;;  %v899_v34 = vpop.f32.mrb[5].mxu1 }
 0x282   : > { %v870_v35 = vadd.f32 %v869_v33, %v641_v57  ;;  %v900_v36 = vadd.f32 %v899_v34, %v666_v24 }
 0x283   : > { %930 = vst [vmem:[#allocation2 + $0x20] sm:$0xff] %v868_v29  ;;  %940 = vst [vmem:[#allocation2 + $0x70] sm:$0xff] %v898_v31 }
 0x284   : > { %931 = vst [vmem:[#allocation2 + $0x28] sm:$0xff] %v870_v35  ;;  %941 = vst [vmem:[#allocation2 + $0x78] sm:$0xff] %v900_v36  ;;  %v873_v41 = vpop.f32.mrb[14].mxu0  ;;  %v903_v43 = vpop.f32.mrb[6].mxu1 }
 0x285   : > { %v874_v44 = vadd.f32 %v873_v41, %v646_v58  ;;  %v904_v46 = vadd.f32 %v903_v43, %v671_v38  ;;  %v875_v49 = vpop.f32.mrb[15].mxu0  ;;  %v905_v25 = vpop.f32.mrb[7].mxu1 }
 0x286   : > { %v876_v50 = vadd.f32 %v875_v49, %v646_v58  ;;  %v906_v47 = vadd.f32 %v905_v25, %v671_v38 }
 0x287   : > { %932 = vst [vmem:[#allocation2 + $0x30] sm:$0xff] %v874_v44  ;;  %942 = vst [vmem:[#allocation2 + $0x80] sm:$0xff] %v904_v46 }
 0x288   : > { %933 = vst [vmem:[#allocation2 + $0x38] sm:$0xff] %v876_v50  ;;  %943 = vst [vmem:[#allocation2 + $0x88] sm:$0xff] %v906_v47  ;;  %v879_v51 = vpop.f32.mrb[16].mxu0  ;;  %v909_v52 = vpop.f32.mrb[8].mxu1 }
 0x289   : > { %v880_v53 = vadd.f32 %v879_v51, %v651_v59  ;;  %v910_v54 = vadd.f32 %v909_v52, %v676_v48  ;;  %v881_v55 = vpop.f32.mrb[17].mxu0  ;;  %v911_v56 = vpop.f32.mrb[9].mxu1 }
 0x28a   : > { %v882_v57 = vadd.f32 %v881_v55, %v651_v59  ;;  %v912_v60 = vadd.f32 %v911_v56, %v676_v48 }
 0x28b   : > { %934 = vst [vmem:[#allocation2 + $0x40] sm:$0xff] %v880_v53  ;;  %944 = vst [vmem:[#allocation2 + $0x90] sm:$0xff] %v910_v54 }
 0x28c   : > { %935 = vst [vmem:[#allocation2 + $0x48] sm:$0xff] %v882_v57  ;;  %945 = vst [vmem:[#allocation2 + $0x98] sm:$0xff] %v912_v60  ;;  %v915_v58 = vpop.f32.mrb[10].mxu1 }
 0x28d   : > { %v916_v2 = vadd.f32 %v915_v58, %v681_v63  ;;  %v917_v3 = vpop.f32.mrb[11].mxu1 }
 0x28e   : > { %v918_v4 = vadd.f32 %v917_v3, %v681_v63 }
 0x28f   : > { %946 = vst [vmem:[#allocation2 + $0xa0] sm:$0xff] %v916_v2 }
 0x290   : > { %947 = vst [vmem:[#allocation2 + $0xa8] sm:$0xff] %v918_v4  ;;  %v921_v6 = vpop.f32.mrb[12].mxu1 }
 0x291   : > { %v922_v9 = vadd.f32 %v921_v6, %v686_v5  ;;  %v923_v10 = vpop.f32.mrb[13].mxu1 }
 0x292   : > { %v924_v11 = vadd.f32 %v923_v10, %v686_v5 }
 0x293   : > { %948 = vst [vmem:[#allocation2 + $0xb0] sm:$0xff] %v922_v9 }
 0x294   : > { %949 = vst [vmem:[#allocation2 + $0xb8] sm:$0xff] %v924_v11 }
 0x295 LB: >> { %v4554_v23 = vld [vmem:[#allocation9_spill] sm:$0xff]  ;;  %s2634_s22 = sshll.u32 %s3273_s26, 2  ;;  %v4555_v37 = vld [vmem:[#allocation11_spill] sm:$0xff]  ;;  %v4556_v62 = vld [vmem:[#allocation14_spill] sm:$0xff]  ;;  %s2633_s30 = sshll.u32 %s3273_s26, 3  ;;  %v3280_v20 = vmov 0   ;;  %s3273_s26 = sphi %s3676_s26, %s971_s26  }
 0x296   : >> { %2765 = vmatprep.mubr.msk.bf16.mxu0 %vm688_vm2, %v4554_v23  ;;  %s975_s12 = scalar_lea.vmem %s4476_s5, %s2634_s22  ;;  %v4557_v8 = vld [vmem:[#allocation16_spill] sm:$0xff]  ;;  %v4558_v19 = vld [vmem:[#allocation18_spill] sm:$0xff]  ;;  %v4564_v61 = vld [vmem:[#allocation13_spill] sm:$0xff]  ;;  %s3722_s13 = sshra.s32 %s2633_s30, 3  ;;  %1318 = vmatprep.mubr.bf16.mxu1 %v3280_v20  ;;  %vm1231_vm4 = vcmask 64512  }
 0x297   : >> { %v976_v59 = vld [vmem:[%s975_s12] sm:$0xf]  ;;  %v4559_v30 = vld [vmem:[#allocation20_spill] sm:$0xff]  ;;  %v4560_v39 = vld [vmem:[#allocation22_spill] sm:$0xff]  ;;  %s2686_s14 = sshll.u32 %s3722_s13, 4  ;;  %s977_s22 = scalar_lea.vmem %s4477_s6, %s3273_s26 }
 0x298   : >> { %2885 = vmatprep.subr.msk.bf16.mxu0 %vm688_vm2, %v976_v59  ;;  %v1034_v12 = vsel %vm688_vm2, %v976_v59, 0  ;;  %v4561_v45 = vld [vmem:[#allocation24_spill] sm:$0xff]  ;;  %v4562_v28 = vld [vmem:[#allocation10_spill] sm:$0xff]  ;;  %v4565_v7 = vld [vmem:[#allocation15_spill] sm:$0xff]  ;;  %s1201_s15 = scalar_lea.vmem [#allocation2], %s2686_s14  ;;  %s973_s24 = sadd.s32 32, %s2633_s30 }
 0x299   : >> { %2764 = vmatpush3.bf16.xpose.msra.mxu0 %v1034_v12  ;;  %v4563_v40 = vld [vmem:[#allocation12_spill] sm:$0xff]  ;;  %v4566_v13 = vld [vmem:[#allocation17_spill] sm:$0xff]  ;;  %v4567_v21 = vld [vmem:[#allocation19_spill] sm:$0xff]  ;;  %s1206_s25 = sshra.s32 %s973_s24, 3  ;;  %s971_s26 = sadd.s32 1, %s3273_s26  }
 0x29a   : >> { %v4568_v32 = vld [vmem:[#allocation21_spill] sm:$0xff]  ;;  %v4569_v42 = vld [vmem:[#allocation23_spill] sm:$0xff]  ;;  %s4305_s12 = sshll.u32 %s1206_s25, 4  ;;  %p968_p11 = scmp.ge.s32.totalorder %s971_s26, 4  }
 0x29b   : >> { %v1203_v14 = vld [vmem:[%s1201_s15 + $0x8] sm:$0xff]  ;;  %v1202_v15 = vld [vmem:[%s1201_s15] sm:$0xff]  ;;  %s1210_s30 = scalar_lea.vmem [#allocation2], %s4305_s12  ;;  %s2065_s15 = scalar_lea.vmem [#allocation3], %s2686_s14 }
 0x29c   : >> { %v1205_v16 = vpack.c.bf16 %v1203_v14, %v1203_v14  ;;  %v1204_v17 = vpack.c.bf16 %v1202_v15, %v1202_v15  ;;  %v3734_v22 = vld [vmem:[%s977_s22] ss:$0 sm:$0xff]  ;;  %s2500_s26 = sshll.u32 (%p968_p11), %s3674_s19, 4  ;;  %s4634_s29 = sand.u32 (%p968_p11), 1, %s3261_s18   ;;  %s4418_s26 = int_to_ptr.vmem [resolvable:$true] %s2500_s26 }
 0x29d   : > { %s4430_s16 = scalar_lea.sflag (%p968_p11), [#allocation5], %s4634_s29  ;;  %s3203_s22 = scalar_lea.vmem (%p968_p11), %s4418_s26, 1024 }
 0x29e   : >> { %2656 = vmatprep.subr.msk.bf16.mxu1 %vm430_vm0, %v1205_v16  ;;  %v1281_v18 = vsel %vm430_vm0, %v1204_v17, 0  ;;  %p3204_p12 = scmp.ne.s32.totalorder (%p968_p11), %s4418_s26, %s3203_s22  ;;  %s3282_s24 = smov (%p968_p11), [#allocation4]  }
 0x29f   : >> { %1287 = vmatpush1.bf16.msra.mxu1 %v1281_v18  ;;  %s3207_s25 = sshll.u32 (%p968_p11), %s3282_s24, 4  ;;  %s3208_s25 = int_to_ptr.vmem [resolvable:$false] %s3207_s25 }
 0x2a0   : >> { %2766 = vmatmul.mubr.msk.bf16.vlgmr.msra.gmra.mrb[0].mxu0 %vm688_vm2, %v4555_v37  ;;  %p3205_p13 = pnand (%p968_p11), %p3204_p12, %p3383_p5  ;;  %s3209_s12 = scalar_lea.vmem (%p968_p11), %s3208_s25, 2048 }
 0x2a1   : >> { %2769 = vmatprep.mubr.msk.bf16.mxu0 %vm688_vm2, %v4556_v62  ;;  %p3210_p1 = scmp.lt.s32.totalorder (%p968_p11), %s4418_s26, %s3208_s25  ;;  %p3211_p2 = scmp.lt.s32.totalorder (%p968_p11), %s3209_s12, %s3203_s22 }
 0x2a2   : > { %p3206_p0 = pneg (%p968_p11), %p3205_p13 }
 0x2a3   : > { %p3212_p3 = por (%p968_p11), %p3211_p2, %p3210_p1 }
 0x2a5   : > { %p3213_p4 = pnand (%p968_p11), %p3212_p3, %p3206_p0 }
 0x2a8   : >> { %2770 = vmatmul.mubr.msk.bf16.gmra.mrb[4].mxu0 %vm688_vm2, %v4557_v8 }
 0x2a9   : >> { %2773 = vmatprep.mubr.msk.bf16.mxu0 %vm688_vm2, %v4558_v19 }
 0x2b0   : >> { %2774 = vmatmul.mubr.msk.bf16.gmra.mrb[8].mxu0 %vm688_vm2, %v4559_v30 }
 0x2b1   : >> { %2777 = vmatprep.mubr.msk.bf16.mxu0 %vm688_vm2, %v4560_v39 }
 0x2b8   : >> { %2778 = vmatmul.mubr.msk.bf16.gmra.mrb[12].mxu0 %vm688_vm2, %v4561_v45 }
 0x2b9   : >> { %2781 = vmatprep.mubr.msk.bf16.mxu0 %vm688_vm2, %v4562_v28 }
 0x2c0   : >> { %2782 = vmatmul.mubr.msk.bf16.gmra.mrb[16].mxu0 %vm688_vm2, %v4563_v40 }
 0x2c1   : >> { %2785 = vmatprep.mubr.msk.bf16.mxu0 %vm688_vm2, %v4564_v61 }
 0x2c8   : >> { %2786 = vmatmul.mubr.msk.bf16.gmra.mrb[20].mxu0 %vm688_vm2, %v4565_v7 }
 0x2c9   : >> { %2789 = vmatprep.mubr.msk.bf16.mxu0 %vm688_vm2, %v4566_v13 }
 0x2d0   : >> { %2790 = vmatmul.mubr.msk.bf16.gmra.mrb[24].mxu0 %vm688_vm2, %v4567_v21 }
 0x2d1   : >> { %2793 = vmatprep.mubr.msk.bf16.mxu0 %vm688_vm2, %v4568_v32 }
 0x2d8   : >> { %2794 = vmatmul.mubr.msk.bf16.gmra.mrb[28].mxu0 %vm688_vm2, %v4569_v42 }
 0x373   : >> { %v2767_v24 = vpop.f32.mrb[0].mxu0 }
 0x374   : >> { %v1070_v26 = vpop.f32.mrb[1].mxu0  ;;  %v1079_v29 = vadd.f32 %v2767_v24, %v3734_v22 }
 0x375   : >> { %v2768_v27 = vpop.f32.mrb[2].mxu0  ;;  %v1071_v34 = vadd.f32 %v3734_v22, %v1070_v26 }
 0x376   : >> { %v1082_v31 = vadd.f32 %v2768_v27, %v3734_v22  ;;  %v1073_v33 = vpop.f32.mrb[3].mxu0 }
 0x377   : >> { %v1074_v35 = vadd.f32 %v3734_v22, %v1073_v33 }
 0x378   : >> { %v1216_v36 = vpack.c.bf16 %v1082_v31, %v1079_v29 }
 0x379   : >> { %v1215_v38 = vpack.c.bf16 %v1074_v35, %v1071_v34 }
 0x37b   : >> { %2657 = vmatmul.mubr.msk.bf16.vlgmr.msra.gmra.mrb[0].mxu1 %vm1231_vm4, %v1215_v38  ;;  %v2771_v41 = vpop.f32.mrb[4].mxu0 }
 0x37c   : >> { %v1095_v43 = vadd.f32 %v2771_v41, %v3734_v22  ;;  %1328 = vmatprep.mubr.bf16.mxu1 %v3280_v20  ;;  %v1086_v44 = vpop.f32.mrb[5].mxu0 }
 0x37d   : >> { %v1087_v46 = vadd.f32 %v3734_v22, %v1086_v44  ;;  %v2772_v49 = vpop.f32.mrb[6].mxu0 }
 0x37e   : >> { %v1098_v25 = vadd.f32 %v2772_v49, %v3734_v22  ;;  %v1089_v50 = vpop.f32.mrb[7].mxu0 }
 0x37f   : >> { %v1090_v47 = vadd.f32 %v3734_v22, %v1089_v50 }
 0x380   : >> { %v1218_v48 = vpack.c.bf16 %v1098_v25, %v1095_v43 }
 0x381   : >> { %v1217_v51 = vpack.c.bf16 %v1090_v47, %v1087_v46 }
 0x383   : >> { %2658 = vmatmul.mubr.msk.bf16.gmra.mrb[4].mxu1 %vm1231_vm4, %v1216_v36  ;;  %v2775_v52 = vpop.f32.mrb[8].mxu0 }
 0x384   : >> { %1338 = vmatprep.mubr.bf16.mxu1 %v3280_v20  ;;  %v1111_v53 = vadd.f32 %v2775_v52, %v3734_v22  ;;  %v1102_v54 = vpop.f32.mrb[9].mxu0 }
 0x385   : >> { %v1103_v55 = vadd.f32 %v3734_v22, %v1102_v54  ;;  %v2776_v56 = vpop.f32.mrb[10].mxu0 }
 0x386   : >> { %v1114_v57 = vadd.f32 %v2776_v56, %v3734_v22  ;;  %v1105_v60 = vpop.f32.mrb[11].mxu0 }
 0x387   : >> { %v1106_v63 = vadd.f32 %v3734_v22, %v1105_v60 }
 0x388   : >> { %v1220_v58 = vpack.c.bf16 %v1114_v57, %v1111_v53 }
 0x389   : >> { %v1219_v2 = vpack.c.bf16 %v1106_v63, %v1103_v55 }
 0x38b   : >> { %2659 = vmatmul.mubr.msk.bf16.gmra.mrb[8].mxu1 %vm1231_vm4, %v1217_v51  ;;  %v2779_v3 = vpop.f32.mrb[12].mxu0 }
 0x38c   : >> { %1348 = vmatprep.mubr.bf16.mxu1 %v3280_v20  ;;  %v1127_v4 = vadd.f32 %v2779_v3, %v3734_v22  ;;  %v1118_v5 = vpop.f32.mrb[13].mxu0 }
 0x38d   : >> { %v1119_v6 = vadd.f32 %v3734_v22, %v1118_v5  ;;  %v2780_v9 = vpop.f32.mrb[14].mxu0 }
 0x38e   : >> { %v1130_v10 = vadd.f32 %v2780_v9, %v3734_v22  ;;  %v1121_v11 = vpop.f32.mrb[15].mxu0 }
 0x38f   : >> { %v1122_v59 = vadd.f32 %v3734_v22, %v1121_v11 }
 0x390   : >> { %v1222_v12 = vpack.c.bf16 %v1130_v10, %v1127_v4 }
 0x391   : >> { %v1221_v14 = vpack.c.bf16 %v1122_v59, %v1119_v6 }
 0x393   : >> { %2660 = vmatmul.mubr.msk.bf16.gmra.mrb[12].mxu1 %vm1231_vm4, %v1218_v48  ;;  %v2783_v15 = vpop.f32.mrb[16].mxu0 }
 0x394   : >> { %1358 = vmatprep.mubr.bf16.mxu1 %v3280_v20  ;;  %v1143_v16 = vadd.f32 %v2783_v15, %v3734_v22  ;;  %v1134_v17 = vpop.f32.mrb[17].mxu0 }
 0x395   : >> { %v1135_v18 = vadd.f32 %v3734_v22, %v1134_v17  ;;  %v2784_v24 = vpop.f32.mrb[18].mxu0 }
 0x396   : >> { %v1146_v26 = vadd.f32 %v2784_v24, %v3734_v22  ;;  %v1137_v27 = vpop.f32.mrb[19].mxu0 }
 0x397   : >> { %v1138_v29 = vadd.f32 %v3734_v22, %v1137_v27 }
 0x398   : >> { %v1224_v31 = vpack.c.bf16 %v1146_v26, %v1143_v16 }
 0x399   : >> { %v1223_v33 = vpack.c.bf16 %v1138_v29, %v1135_v18 }
 0x39b   : >> { %2661 = vmatmul.mubr.msk.bf16.gmra.mrb[16].mxu1 %vm1231_vm4, %v1219_v2  ;;  %v2787_v34 = vpop.f32.mrb[20].mxu0 }
 0x39c   : >> { %1368 = vmatprep.mubr.bf16.mxu1 %v3280_v20  ;;  %v1159_v35 = vadd.f32 %v2787_v34, %v3734_v22  ;;  %v1150_v36 = vpop.f32.mrb[21].mxu0 }
 0x39d   : >> { %v1151_v38 = vadd.f32 %v3734_v22, %v1150_v36  ;;  %v2788_v41 = vpop.f32.mrb[22].mxu0 }
 0x39e   : >> { %v1162_v43 = vadd.f32 %v2788_v41, %v3734_v22  ;;  %v1153_v44 = vpop.f32.mrb[23].mxu0 }
 0x39f   : >> { %v1154_v46 = vadd.f32 %v3734_v22, %v1153_v44 }
 0x3a0   : >> { %v1226_v49 = vpack.c.bf16 %v1162_v43, %v1159_v35 }
 0x3a1   : >> { %v1225_v25 = vpack.c.bf16 %v1154_v46, %v1151_v38 }
 0x3a3   : >> { %2662 = vmatmul.mubr.msk.bf16.gmra.mrb[20].mxu1 %vm1231_vm4, %v1220_v58  ;;  %v2791_v50 = vpop.f32.mrb[24].mxu0 }
 0x3a4   : >> { %1378 = vmatprep.mubr.bf16.mxu1 %v3280_v20  ;;  %v1175_v47 = vadd.f32 %v2791_v50, %v3734_v22  ;;  %v1166_v48 = vpop.f32.mrb[25].mxu0 }
 0x3a5   : >> { %v1167_v51 = vadd.f32 %v3734_v22, %v1166_v48  ;;  %v2792_v52 = vpop.f32.mrb[26].mxu0 }
 0x3a6   : >> { %v1178_v53 = vadd.f32 %v2792_v52, %v3734_v22  ;;  %v1169_v54 = vpop.f32.mrb[27].mxu0 }
 0x3a7   : >> { %v1170_v55 = vadd.f32 %v3734_v22, %v1169_v54 }
 0x3a8   : >> { %v1228_v56 = vpack.c.bf16 %v1178_v53, %v1175_v47 }
 0x3a9   : >> { %v1227_v57 = vpack.c.bf16 %v1170_v55, %v1167_v51 }
 0x3ab   : >> { %2663 = vmatmul.mubr.msk.bf16.gmra.mrb[24].mxu1 %vm1231_vm4, %v1221_v14  ;;  %v2795_v60 = vpop.f32.mrb[28].mxu0 }
 0x3ac   : >> { %1388 = vmatprep.mubr.bf16.mxu1 %v3280_v20  ;;  %v1191_v63 = vadd.f32 %v2795_v60, %v3734_v22  ;;  %v1182_v58 = vpop.f32.mrb[29].mxu0 }
 0x3ad   : >> { %v1183_v2 = vadd.f32 %v3734_v22, %v1182_v58  ;;  %v2796_v3 = vpop.f32.mrb[30].mxu0 }
 0x3ae   : >> { %v1194_v4 = vadd.f32 %v2796_v3, %v3734_v22  ;;  %v1185_v5 = vpop.f32.mrb[31].mxu0 }
 0x3af   : >> { %v1186_v6 = vadd.f32 %v3734_v22, %v1185_v5 }
 0x3b0   : >> { %v1230_v9 = vpack.c.bf16 %v1194_v4, %v1191_v63 }
 0x3b1   : >> { %v1229_v10 = vpack.c.bf16 %v1186_v6, %v1183_v2 }
 0x3b3   : >> { %2664 = vmatmul.mubr.msk.bf16.gmra.mrb[28].mxu1 %vm1231_vm4, %v1222_v12 }
 0x3b4   : >> { %1398 = vmatprep.mubr.bf16.mxu1 %v3280_v20 }
 0x3bb   : >> { %2665 = vmatmul.mubr.msk.bf16.gmra.mrb[32].mxu1 %vm1231_vm4, %v1223_v33 }
 0x3bc   : >> { %1408 = vmatprep.mubr.bf16.mxu1 %v3280_v20 }
 0x3c3   : >> { %2666 = vmatmul.mubr.msk.bf16.gmra.mrb[36].mxu1 %vm1231_vm4, %v1224_v31 }
 0x3c4   : >> { %1418 = vmatprep.mubr.bf16.mxu1 %v3280_v20 }
 0x3cb   : >> { %2667 = vmatmul.mubr.msk.bf16.gmra.mrb[40].mxu1 %vm1231_vm4, %v1225_v25 }
 0x3cc   : >> { %1428 = vmatprep.mubr.bf16.mxu1 %v3280_v20 }
 0x3d3   : >> { %2668 = vmatmul.mubr.msk.bf16.gmra.mrb[44].mxu1 %vm1231_vm4, %v1226_v49 }
 0x3d4   : >> { %1438 = vmatprep.mubr.bf16.mxu1 %v3280_v20 }
 0x3db   : >> { %2669 = vmatmul.mubr.msk.bf16.gmra.mrb[48].mxu1 %vm1231_vm4, %v1227_v57 }
 0x3dc   : >> { %1448 = vmatprep.mubr.bf16.mxu1 %v3280_v20 }
 0x3e3   : >> { %2670 = vmatmul.mubr.msk.bf16.gmra.mrb[52].mxu1 %vm1231_vm4, %v1228_v56 }
 0x3e4   : >> { %1458 = vmatprep.mubr.bf16.mxu1 %v3280_v20 }
 0x3eb   : >> { %2671 = vmatmul.mubr.msk.bf16.gmra.mrb[56].mxu1 %vm1231_vm4, %v1229_v10 }
 0x3ec   : >> { %1468 = vmatprep.mubr.bf16.mxu1 %v3280_v20 }
 0x3f3   : >> { %2672 = vmatmul.mubr.msk.bf16.gmra.mrb[60].mxu1 %vm1231_vm4, %v1230_v9 }
 0x44e   : >> { %v3799_v22 = vpop.f32.mrb[0].mxu1 }
 0x44f   : >> { %v3801_v11 = vpop.f32.mrb[1].mxu1 }
 0x450   : >> { %v3803_v59 = vpop.f32.mrb[2].mxu1  ;;  %v1479_v12 = vmax.f32 %v3799_v22, %v3801_v11 }
 0x451   : >> { %v3807_v14 = vpop.f32.mrb[3].mxu1 }
 0x452   : >> { %1480 = vmax.xlane.f32.xlu0 %v1479_v12  ;;  %v1482_v15 = vmax.f32 %v3803_v59, %v3807_v14 }
 0x456   : >> { %1483 = vmax.xlane.f32.xlu0 %v1482_v15  ;;  %v3811_v16 = vpop.f32.mrb[4].mxu1 }
 0x457   : >> { %v3813_v20 = vpop.f32.mrb[5].mxu1 }
 0x458   : >> { %v3815_v17 = vpop.f32.mrb[6].mxu1  ;;  %v1485_v18 = vmax.f32 %v3811_v16, %v3813_v20 }
 0x459   : >> { %v3819_v24 = vpop.f32.mrb[7].mxu1 }
 0x45a   : >> { %1486 = vmax.xlane.f32.xlu1 %v1485_v18  ;;  %v1488_v26 = vmax.f32 %v3815_v17, %v3819_v24 }
 0x45e   : >> { %1489 = vmax.xlane.f32.xlu1 %v1488_v26  ;;  %v3823_v27 = vpop.f32.mrb[8].mxu1 }
 0x45f   : >> { %v3825_v29 = vpop.f32.mrb[9].mxu1 }
 0x460   : >> { %v3827_v31 = vpop.f32.mrb[10].mxu1  ;;  %v1491_v33 = vmax.f32 %v3823_v27, %v3825_v29 }
 0x461   : >> { %v3831_v34 = vpop.f32.mrb[11].mxu1 }
 0x462   : >> { %1492 = vmax.xlane.f32.xlu0 %v1491_v33  ;;  %v1494_v35 = vmax.f32 %v3827_v31, %v3831_v34 }
 0x464   : >> { %1495 = vmax.xlane.f32.xlu1 %v1494_v35 }
 0x466   : >> { %v3835_v36 = vpop.f32.mrb[12].mxu1 }
 0x467   : >> { %v3837_v38 = vpop.f32.mrb[13].mxu1 }
 0x468   : >> { %v3839_v41 = vpop.f32.mrb[14].mxu1  ;;  %v1497_v43 = vmax.f32 %v3835_v36, %v3837_v38 }
 0x469   : >> { %v3843_v44 = vpop.f32.mrb[15].mxu1 }
 0x46a   : >> { %1498 = vmax.xlane.f32.xlu0 %v1497_v43  ;;  %v1500_v46 = vmax.f32 %v3839_v41, %v3843_v44 }
 0x46c   : >> { %1501 = vmax.xlane.f32.xlu1 %v1500_v46 }
 0x46e   : >> { %v3847_v49 = vpop.f32.mrb[16].mxu1 }
 0x46f   : >> { %v3849_v25 = vpop.f32.mrb[17].mxu1 }
 0x470   : >> { %v3851_v50 = vpop.f32.mrb[18].mxu1  ;;  %v1503_v47 = vmax.f32 %v3847_v49, %v3849_v25 }
 0x471   : >> { %v3855_v48 = vpop.f32.mrb[19].mxu1 }
 0x472   : >> { %1504 = vmax.xlane.f32.xlu0 %v1503_v47  ;;  %v1506_v51 = vmax.f32 %v3851_v50, %v3855_v48 }
 0x474   : >> { %1507 = vmax.xlane.f32.xlu1 %v1506_v51 }
 0x476   : >> { %v3859_v52 = vpop.f32.mrb[20].mxu1 }
 0x477   : >> { %v3861_v53 = vpop.f32.mrb[21].mxu1 }
 0x478   : >> { %v3863_v54 = vpop.f32.mrb[22].mxu1  ;;  %v1509_v55 = vmax.f32 %v3859_v52, %v3861_v53 }
 0x479   : >> { %v3867_v56 = vpop.f32.mrb[23].mxu1 }
 0x47a   : >> { %1510 = vmax.xlane.f32.xlu0 %v1509_v55  ;;  %v1512_v57 = vmax.f32 %v3863_v54, %v3867_v56 }
 0x47c   : >> { %1513 = vmax.xlane.f32.xlu1 %v1512_v57 }
 0x47e   : >> { %v3871_v60 = vpop.f32.mrb[24].mxu1 }
 0x47f   : >> { %v3873_v63 = vpop.f32.mrb[25].mxu1 }
 0x480   : >> { %v3875_v58 = vpop.f32.mrb[26].mxu1  ;;  %v1515_v2 = vmax.f32 %v3871_v60, %v3873_v63 }
 0x481   : >> { %v3879_v3 = vpop.f32.mrb[27].mxu1 }
 0x482   : >> { %1516 = vmax.xlane.f32.xlu0 %v1515_v2  ;;  %v1518_v4 = vmax.f32 %v3875_v58, %v3879_v3 }
 0x484   : >> { %1519 = vmax.xlane.f32.xlu1 %v1518_v4 }
 0x486   : >> { %v3883_v5 = vpop.f32.mrb[28].mxu1 }
 0x487   : >> { %v3885_v6 = vpop.f32.mrb[29].mxu1 }
 0x488   : >> { %v3887_v9 = vpop.f32.mrb[30].mxu1  ;;  %v1521_v10 = vmax.f32 %v3883_v5, %v3885_v6 }
 0x489   : >> { %v3891_v12 = vpop.f32.mrb[31].mxu1 }
 0x48a   : >> { %1522 = vmax.xlane.f32.xlu0 %v1521_v10  ;;  %v1524_v15 = vmax.f32 %v3887_v9, %v3891_v12 }
 0x48c   : >> { %1525 = vmax.xlane.f32.xlu1 %v1524_v15 }
 0x48e   : >> { %v3895_v18 = vpop.f32.mrb[32].mxu1 }
 0x48f   : >> { %v3897_v26 = vpop.f32.mrb[33].mxu1 }
 0x490   : >> { %v3899_v33 = vpop.f32.mrb[34].mxu1  ;;  %v1527_v35 = vmax.f32 %v3895_v18, %v3897_v26 }
 0x491   : >> { %v3903_v43 = vpop.f32.mrb[35].mxu1 }
 0x492   : >> { %4570 = vst [vmem:[#allocation25_spill] sm:$0xff] %v3903_v43  ;;  %1528 = vmax.xlane.f32.xlu0 %v1527_v35  ;;  %v1530_v46 = vmax.f32 %v3899_v33, %v3903_v43 }
 0x494   : >> { %1531 = vmax.xlane.f32.xlu1 %v1530_v46 }
 0x496   : >> { %v3907_v47 = vpop.f32.mrb[36].mxu1 }
 0x497   : >> { %4571 = vst [vmem:[#allocation26_spill] sm:$0xff] %v3907_v47  ;;  %v3909_v51 = vpop.f32.mrb[37].mxu1 }
 0x498   : >> { %4572 = vst [vmem:[#allocation27_spill] sm:$0xff] %v3909_v51  ;;  %v3911_v55 = vpop.f32.mrb[38].mxu1  ;;  %v1533_v57 = vmax.f32 %v3907_v47, %v3909_v51 }
 0x499   : >> { %4573 = vst [vmem:[#allocation28_spill] sm:$0xff] %v3911_v55  ;;  %v3915_v2 = vpop.f32.mrb[39].mxu1 }
 0x49a   : >> { %4574 = vst [vmem:[#allocation29_spill] sm:$0xff] %v3915_v2  ;;  %1534 = vmax.xlane.f32.xlu0 %v1533_v57  ;;  %v1536_v4 = vmax.f32 %v3911_v55, %v3915_v2 }
 0x49c   : >> { %1537 = vmax.xlane.f32.xlu1 %v1536_v4 }
 0x49e   : >> { %v3919_v10 = vpop.f32.mrb[40].mxu1 }
 0x49f   : >> { %4575 = vst [vmem:[#allocation30_spill] sm:$0xff] %v3919_v10  ;;  %v3921_v15 = vpop.f32.mrb[41].mxu1 }
 0x4a0   : >> { %4576 = vst [vmem:[#allocation31_spill] sm:$0xff] %v3921_v15  ;;  %v3923_v35 = vpop.f32.mrb[42].mxu1  ;;  %v1539_v46 = vmax.f32 %v3919_v10, %v3921_v15 }
 0x4a1   : >> { %4577 = vst [vmem:[#allocation32_spill] sm:$0xff] %v3923_v35  ;;  %v3927_v1 = vpop.f32.mrb[43].mxu1 }
 0x4a2   : >> { %4578 = vst [vmem:[#allocation33_spill] sm:$0xff] %v3927_v1  ;;  %1540 = vmax.xlane.f32.xlu0 %v1539_v46  ;;  %v1542_v0 = vmax.f32 %v3923_v35, %v3927_v1 }
 0x4a4   : >> { %1543 = vmax.xlane.f32.xlu1 %v1542_v0 }
 0x4a6   : >> { %v3931_v57 = vpop.f32.mrb[44].mxu1 }
 0x4a7   : >> { %4579 = vst [vmem:[#allocation34_spill] sm:$0xff] %v3931_v57  ;;  %v3933_v7 = vpop.f32.mrb[45].mxu1 }
 0x4a8   : >> { %4580 = vst [vmem:[#allocation35_spill] sm:$0xff] %v3933_v7  ;;  %v3935_v4 = vpop.f32.mrb[46].mxu1  ;;  %v1545_v8 = vmax.f32 %v3931_v57, %v3933_v7 }
 0x4a9   : >> { %4581 = vst [vmem:[#allocation36_spill] sm:$0xff] %v3935_v4  ;;  %v3939_v13 = vpop.f32.mrb[47].mxu1 }
 0x4aa   : >> { %4582 = vst [vmem:[#allocation37_spill] sm:$0xff] %v3939_v13  ;;  %1546 = vmax.xlane.f32.xlu0 %v1545_v8  ;;  %v1548_v19 = vmax.f32 %v3935_v4, %v3939_v13 }
 0x4ac   : >> { %1549 = vmax.xlane.f32.xlu1 %v1548_v19 }
 0x4ae   : >> { %v3943_v46 = vpop.f32.mrb[48].mxu1 }
 0x4af   : >> { %v3945_v21 = vpop.f32.mrb[49].mxu1 }
 0x4b0   : >> { %v3947_v0 = vpop.f32.mrb[50].mxu1 }
 0x4b1   : >> { %v3951_v28 = vpop.f32.mrb[51].mxu1 }
 0x4b6   : >> { %v3955_v32 = vpop.f32.mrb[52].mxu1 }
 0x4b7   : >> { %v3957_v8 = vpop.f32.mrb[53].mxu1 }
 0x4b8   : >> { %v3959_v37 = vpop.f32.mrb[54].mxu1 }
 0x4b9   : >> { %v3963_v39 = vpop.f32.mrb[55].mxu1 }
 0x4be   : >> { %v3967_v23 = vpop.f32.mrb[56].mxu1 }
 0x4bf   : >> { %v3969_v42 = vpop.f32.mrb[57].mxu1 }
 0x4c0   : >> { %v3971_v45 = vpop.f32.mrb[58].mxu1 }
 0x4c1   : >> { %v3975_v61 = vpop.f32.mrb[59].mxu1 }
 0x4c6   : >> { %v3979_v19 = vpop.f32.mrb[60].mxu1 }
 0x4c7   : >> { %v3981_v13 = vpop.f32.mrb[61].mxu1 }
 0x4c8   : >> { %v3983_v4 = vpop.f32.mrb[62].mxu1 }
 0x4c9   : >> { %v3987_v7 = vpop.f32.mrb[63].mxu1 }
 0x4df   : >> { %v1481_v30 = vpop.xlane.xlu0 %1480 }
 0x4e0   : >> { %v1575_v1 = vsub.f32 %v3799_v22, %v1481_v30  ;;  %v1576_v35 = vsub.f32 %v3801_v11, %v1481_v30 }
 0x4e2   : >> { %v1639_v62 = vmul.f32 1.442695, %v1575_v1  ;;  %v1641_v15 = vmul.f32 1.442695, %v1576_v35 }
 0x4e3   : >> { %v1484_v10 = vpop.xlane.xlu0 %1483 }
 0x4e4   : >> { %3005 = vpow2.f32 %v1639_v62  ;;  %v1577_v2 = vsub.f32 %v3803_v59, %v1484_v10  ;;  %v1578_v55 = vsub.f32 %v3807_v14, %v1484_v10 }
 0x4e5   : >> { %3007 = vpow2.f32 %v1641_v15 }
 0x4e6   : >> { %v1643_v40 = vmul.f32 1.442695, %v1577_v2  ;;  %v1645_v51 = vmul.f32 1.442695, %v1578_v55 }
 0x4e7   : >> { %v1487_v47 = vpop.xlane.xlu1 %1486 }
 0x4e8   : >> { %3009 = vpow2.f32 %v1643_v40  ;;  %v1579_v57 = vsub.f32 %v3811_v16, %v1487_v47  ;;  %v1580_v43 = vsub.f32 %v3813_v20, %v1487_v47 }
 0x4e9   : >> { %3011 = vpow2.f32 %v1645_v51 }
 0x4ea   : >> { %v1647_v22 = vmul.f32 1.442695, %v1579_v57  ;;  %v1649_v30 = vmul.f32 1.442695, %v1580_v43 }
 0x4eb   : >> { %v1490_v1 = vpop.xlane.xlu1 %1489 }
 0x4ec   : >> { %3013 = vpow2.f32 %v1647_v22  ;;  %v1581_v62 = vsub.f32 %v3815_v17, %v1490_v1  ;;  %v1582_v11 = vsub.f32 %v3819_v24, %v1490_v1 }
 0x4ed   : >> { %3015 = vpow2.f32 %v1649_v30  ;;  %v4583_v30 = vmax.f32 %v3943_v46, %v3945_v21 }
 0x4ee   : >> { %v3999_v59 = vpop.eup %3005  ;;  %v1651_v14 = vmul.f32 1.442695, %v1581_v62  ;;  %v1653_v55 = vmul.f32 1.442695, %v1582_v11 }
 0x4ef   : >> { %v4001_v2 = vpop.eup %3007  ;;  %v1493_v40 = vpop.xlane.xlu0 %1492 }
 0x4f0   : >> { %3017 = vpow2.f32 %v1651_v14  ;;  %v1583_v16 = vsub.f32 %v3823_v27, %v1493_v40  ;;  %v1584_v20 = vsub.f32 %v3825_v29, %v1493_v40  ;;  %v1767_v43 = vadd.f32 %v4001_v2, %v3999_v59 }
 0x4f1   : >> { %3019 = vpow2.f32 %v1653_v55  ;;  %v1496_v17 = vpop.xlane.xlu1 %1495 }
 0x4f2   : >> { %v4007_v47 = vpop.eup %3009  ;;  %v1655_v24 = vmul.f32 1.442695, %v1583_v16  ;;  %v1657_v51 = vmul.f32 1.442695, %v1584_v20  ;;  %v1585_v10 = vsub.f32 %v3827_v31, %v1496_v17  ;;  %v1586_v15 = vsub.f32 %v3831_v34, %v1496_v17  ;;  %1768 = vadd.xlane.f32.xlu0 %v1767_v43 }
 0x4f3   : >> { %v4011_v35 = vpop.eup %3011  ;;  %v4584_v17 = vmax.f32 %v3947_v0, %v3951_v28 }
 0x4f4   : >> { %3021 = vpow2.f32 %v1655_v24  ;;  %v1659_v27 = vmul.f32 1.442695, %v1585_v10  ;;  %v1661_v57 = vmul.f32 1.442695, %v1586_v15  ;;  %v1770_v29 = vadd.f32 %v4011_v35, %v4007_v47 }
 0x4f5   : >> { %3023 = vpow2.f32 %v1657_v51 }
 0x4f6   : >> { %v4015_v22 = vpop.eup %3013  ;;  %3025 = vpow2.f32 %v1659_v27  ;;  %1771 = vadd.xlane.f32.xlu1 %v1770_v29  ;;  %1552 = vmax.xlane.f32.xlu0 %v4583_v30 }
 0x4f7   : >> { %v4020_v31 = vpop.eup %3015  ;;  %3027 = vpow2.f32 %v1661_v57  ;;  %v1499_v34 = vpop.xlane.xlu0 %1498 }
 0x4f8   : >> { %v1587_v1 = vsub.f32 %v3835_v36, %v1499_v34  ;;  %v1588_v62 = vsub.f32 %v3837_v38, %v1499_v34  ;;  %v1773_v11 = vadd.f32 %v4020_v31, %v4015_v22 }
 0x4f9   : >> { %v1502_v14 = vpop.xlane.xlu1 %1501 }
 0x4fa   : >> { %v4026_v55 = vpop.eup %3017  ;;  %v1663_v40 = vmul.f32 1.442695, %v1587_v1  ;;  %v1665_v16 = vmul.f32 1.442695, %v1588_v62  ;;  %v1589_v20 = vsub.f32 %v3839_v41, %v1502_v14  ;;  %v1590_v43 = vsub.f32 %v3843_v44, %v1502_v14  ;;  %1774 = vadd.xlane.f32.xlu0 %v1773_v11  ;;  %1555 = vmax.xlane.f32.xlu1 %v4584_v17 }
 0x4fb   : >> { %v4033_v36 = vpop.eup %3019  ;;  %v4585_v41 = vmax.f32 %v3955_v32, %v3957_v8 }
 0x4fc   : >> { %3029 = vpow2.f32 %v1663_v40  ;;  %v1667_v38 = vmul.f32 1.442695, %v1589_v20  ;;  %v1669_v24 = vmul.f32 1.442695, %v1590_v43  ;;  %v1776_v51 = vadd.f32 %v4033_v36, %v4026_v55 }
 0x4fd   : >> { %3031 = vpow2.f32 %v1665_v16  ;;  %v4586_v16 = vmax.f32 %v3959_v37, %v3963_v39 }
 0x4fe   : >> { %v4037_v10 = vpop.eup %3021  ;;  %3033 = vpow2.f32 %v1667_v38  ;;  %1777 = vadd.xlane.f32.xlu1 %v1776_v51  ;;  %1558 = vmax.xlane.f32.xlu0 %v4585_v41 }
 0x4ff   : >> { %v4042_v44 = vpop.eup %3023  ;;  %3035 = vpow2.f32 %v1669_v24  ;;  %v1505_v15 = vpop.xlane.xlu0 %1504 }
 0x500   : >> { %v4044_v27 = vpop.eup %3025  ;;  %v1591_v57 = vsub.f32 %v3847_v49, %v1505_v15  ;;  %v1592_v29 = vsub.f32 %v3849_v25, %v1505_v15  ;;  %v1779_v30 = vadd.f32 %v4042_v44, %v4037_v10 }
 0x501   : >> { %v4050_v34 = vpop.eup %3027  ;;  %v1508_v1 = vpop.xlane.xlu1 %1507 }
 0x502   : >> { %v1671_v62 = vmul.f32 1.442695, %v1591_v57  ;;  %v1673_v11 = vmul.f32 1.442695, %v1592_v29  ;;  %v1593_v14 = vsub.f32 %v3851_v50, %v1508_v1  ;;  %v1594_v40 = vsub.f32 %v3855_v48, %v1508_v1  ;;  %1780 = vadd.xlane.f32.xlu0 %v1779_v30  ;;  %1561 = vmax.xlane.f32.xlu1 %v4586_v16 }
 0x503   : >> { %v1782_v20 = vadd.f32 %v4050_v34, %v4044_v27  ;;  %v4587_v50 = vmax.f32 %v3967_v23, %v3969_v42 }
 0x504   : >> { %3037 = vpow2.f32 %v1671_v62  ;;  %v1675_v49 = vmul.f32 1.442695, %v1593_v14  ;;  %v1677_v25 = vmul.f32 1.442695, %v1594_v40 }
 0x505   : >> { %3039 = vpow2.f32 %v1673_v11  ;;  %v4588_v11 = vmax.f32 %v3971_v45, %v3975_v61 }
 0x506   : >> { %v4059_v43 = vpop.eup %3029  ;;  %3041 = vpow2.f32 %v1675_v49  ;;  %1783 = vadd.xlane.f32.xlu1 %v1782_v20  ;;  %1564 = vmax.xlane.f32.xlu0 %v4587_v50 }
 0x507   : >> { %v4064_v48 = vpop.eup %3031  ;;  %3043 = vpow2.f32 %v1677_v25  ;;  %v1511_v17 = vpop.xlane.xlu0 %1510 }
 0x508   : >> { %v4066_v38 = vpop.eup %3033  ;;  %v1595_v24 = vsub.f32 %v3859_v52, %v1511_v17  ;;  %v1596_v51 = vsub.f32 %v3861_v53, %v1511_v17  ;;  %v1785_v41 = vadd.f32 %v4064_v48, %v4059_v43 }
 0x509   : >> { %v4072_v15 = vpop.eup %3035  ;;  %v1514_v57 = vpop.xlane.xlu1 %1513 }
 0x50a   : >> { %v1679_v29 = vmul.f32 1.442695, %v1595_v24  ;;  %v1681_v30 = vmul.f32 1.442695, %v1596_v51  ;;  %v1597_v1 = vsub.f32 %v3863_v54, %v1514_v57  ;;  %v1598_v62 = vsub.f32 %v3867_v56, %v1514_v57  ;;  %1786 = vadd.xlane.f32.xlu0 %v1785_v41  ;;  %1567 = vmax.xlane.f32.xlu1 %v4588_v11 }
 0x50b   : >> { %v1788_v14 = vadd.f32 %v4072_v15, %v4066_v38  ;;  %v4589_v54 = vmax.f32 %v3979_v19, %v3981_v13 }
 0x50c   : >> { %3045 = vpow2.f32 %v1679_v29  ;;  %v1683_v52 = vmul.f32 1.442695, %v1597_v1  ;;  %v1685_v53 = vmul.f32 1.442695, %v1598_v62 }
 0x50d   : >> { %3047 = vpow2.f32 %v1681_v30  ;;  %v4590_v30 = vmax.f32 %v3983_v4, %v3987_v7 }
 0x50e   : >> { %v4081_v40 = vpop.eup %3037  ;;  %3049 = vpow2.f32 %v1683_v52  ;;  %1789 = vadd.xlane.f32.xlu1 %v1788_v14  ;;  %1570 = vmax.xlane.f32.xlu0 %v4589_v54 }
 0x50f   : >> { %v4086_v56 = vpop.eup %3039  ;;  %3051 = vpow2.f32 %v1685_v53  ;;  %v1517_v16 = vpop.xlane.xlu0 %1516 }
 0x510   : >> { %v4088_v49 = vpop.eup %3041  ;;  %v1599_v25 = vsub.f32 %v3871_v60, %v1517_v16  ;;  %v1600_v20 = vsub.f32 %v3873_v63, %v1517_v16  ;;  %v1791_v50 = vadd.f32 %v4086_v56, %v4081_v40 }
 0x511   : >> { %v4094_v17 = vpop.eup %3043  ;;  %v1520_v24 = vpop.xlane.xlu1 %1519 }
 0x512   : >> { %v1687_v51 = vmul.f32 1.442695, %v1599_v25  ;;  %v1689_v41 = vmul.f32 1.442695, %v1600_v20  ;;  %v1601_v57 = vsub.f32 %v3875_v58, %v1520_v24  ;;  %v1602_v29 = vsub.f32 %v3879_v3, %v1520_v24  ;;  %1792 = vadd.xlane.f32.xlu0 %v1791_v50  ;;  %1573 = vmax.xlane.f32.xlu1 %v4590_v30 }
 0x513   : >> { %v1794_v1 = vadd.f32 %v4094_v17, %v4088_v49 }
 0x514   : >> { %3053 = vpow2.f32 %v1687_v51  ;;  %v1691_v60 = vmul.f32 1.442695, %v1601_v57  ;;  %v1693_v63 = vmul.f32 1.442695, %v1602_v29 }
 0x515   : >> { %3055 = vpow2.f32 %v1689_v41 }
 0x516   : >> { %v4103_v62 = vpop.eup %3045  ;;  %3057 = vpow2.f32 %v1691_v60  ;;  %1795 = vadd.xlane.f32.xlu1 %v1794_v1 }
 0x517   : >> { %v4105_v11 = vpop.eup %3047  ;;  %3059 = vpow2.f32 %v1693_v63  ;;  %v1523_v58 = vpop.xlane.xlu0 %1522 }
 0x518   : >> { %v4107_v3 = vpop.eup %3049  ;;  %v1603_v52 = vsub.f32 %v3883_v5, %v1523_v58  ;;  %v1604_v53 = vsub.f32 %v3885_v6, %v1523_v58  ;;  %v1797_v14 = vadd.f32 %v4105_v11, %v4103_v62 }
 0x519   : >> { %v4113_v54 = vpop.eup %3051  ;;  %v1526_v16 = vpop.xlane.xlu1 %1525 }
 0x51a   : >> { %v1695_v25 = vmul.f32 1.442695, %v1603_v52  ;;  %v1697_v20 = vmul.f32 1.442695, %v1604_v53  ;;  %v1605_v50 = vsub.f32 %v3887_v9, %v1526_v16  ;;  %v1606_v24 = vsub.f32 %v3891_v12, %v1526_v16  ;;  %1798 = vadd.xlane.f32.xlu0 %v1797_v14  ;;  %v4591_v14 = vld [vmem:[#allocation25_spill] sm:$0xff] }
 0x51b   : >> { %v1800_v51 = vadd.f32 %v4113_v54, %v4107_v3 }
 0x51c   : >> { %3061 = vpow2.f32 %v1695_v25  ;;  %v1699_v5 = vmul.f32 1.442695, %v1605_v50  ;;  %v1701_v41 = vmul.f32 1.442695, %v1606_v24 }
 0x51d   : >> { %3063 = vpow2.f32 %v1697_v20  ;;  %1801 = vadd.xlane.f32.xlu1 %v1800_v51 }
 0x51e   : >> { %v4119_v6 = vpop.eup %3053  ;;  %3065 = vpow2.f32 %v1699_v5 }
 0x51f   : >> { %v4121_v57 = vpop.eup %3055  ;;  %3067 = vpow2.f32 %v1701_v41  ;;  %v1529_v29 = vpop.xlane.xlu0 %1528  ;;  %v4595_v41 = vld [vmem:[#allocation27_spill] sm:$0xff] }
 0x520   : >> { %v4123_v30 = vpop.eup %3057  ;;  %v1607_v9 = vsub.f32 %v3895_v18, %v1529_v29  ;;  %v1608_v12 = vsub.f32 %v3897_v26, %v1529_v29  ;;  %v1803_v60 = vadd.f32 %v4121_v57, %v4119_v6 }
 0x521   : >> { %v4129_v63 = vpop.eup %3059  ;;  %v1532_v1 = vpop.xlane.xlu1 %1531 }
 0x522   : >> { %v1703_v58 = vmul.f32 1.442695, %v1607_v9  ;;  %v1705_v52 = vmul.f32 1.442695, %v1608_v12  ;;  %v1609_v53 = vsub.f32 %v3899_v33, %v1532_v1  ;;  %v1610_v16 = vsub.f32 %v4591_v14, %v1532_v1  ;;  %1804 = vadd.xlane.f32.xlu0 %v1803_v60  ;;  %v4594_v33 = vld [vmem:[#allocation26_spill] sm:$0xff]  ;;  %v4598_v14 = vld [vmem:[#allocation29_spill] sm:$0xff] }
 0x523   : >> { %v1806_v25 = vadd.f32 %v4129_v63, %v4123_v30 }
 0x524   : >> { %3069 = vpow2.f32 %v1703_v58  ;;  %v1707_v18 = vmul.f32 1.442695, %v1609_v53  ;;  %v1709_v20 = vmul.f32 1.442695, %v1610_v16 }
 0x525   : >> { %3071 = vpow2.f32 %v1705_v52  ;;  %1807 = vadd.xlane.f32.xlu1 %v1806_v25  ;;  %v4597_v52 = vld [vmem:[#allocation28_spill] sm:$0xff] }
 0x526   : >> { %v4135_v26 = vpop.eup %3061  ;;  %3073 = vpow2.f32 %v1707_v18 }
 0x527   : >> { %4592 = vst [vmem:[#allocation25_spill] sm:$0xff] %v4135_v26  ;;  %v4137_v50 = vpop.eup %3063  ;;  %3075 = vpow2.f32 %v1709_v20  ;;  %v1535_v24 = vpop.xlane.xlu0 %1534 }
 0x528   : >> { %v4139_v51 = vpop.eup %3065  ;;  %v1611_v5 = vsub.f32 %v4594_v33, %v1535_v24  ;;  %v1612_v29 = vsub.f32 %v4595_v41, %v1535_v24  ;;  %v1809_v9 = vadd.f32 %v4137_v50, %v4135_v26  ;;  %v4606_v26 = vld [vmem:[#allocation33_spill] sm:$0xff] }
 0x529   : >> { %4593 = vst [vmem:[#allocation38_spill] sm:$0xff] %v4139_v51  ;;  %v4145_v12 = vpop.eup %3067  ;;  %v1538_v60 = vpop.xlane.xlu1 %1537 }
 0x52a   : >> { %4596 = vst [vmem:[#allocation26_spill] sm:$0xff] %v4145_v12  ;;  %v1711_v1 = vmul.f32 1.442695, %v1611_v5  ;;  %v1713_v58 = vmul.f32 1.442695, %v1612_v29  ;;  %v1613_v53 = vsub.f32 %v4597_v52, %v1538_v60  ;;  %v1614_v16 = vsub.f32 %v4598_v14, %v1538_v60  ;;  %1810 = vadd.xlane.f32.xlu0 %v1809_v9  ;;  %v4602_v29 = vld [vmem:[#allocation30_spill] sm:$0xff] }
 0x52b   : >> { %v1812_v25 = vadd.f32 %v4145_v12, %v4139_v51  ;;  %v4603_v9 = vld [vmem:[#allocation31_spill] sm:$0xff] }
 0x52c   : >> { %3077 = vpow2.f32 %v1711_v1  ;;  %v1715_v18 = vmul.f32 1.442695, %v1613_v53  ;;  %v1717_v20 = vmul.f32 1.442695, %v1614_v16 }
 0x52d   : >> { %3079 = vpow2.f32 %v1713_v58  ;;  %1813 = vadd.xlane.f32.xlu1 %v1812_v25  ;;  %v4605_v25 = vld [vmem:[#allocation32_spill] sm:$0xff] }
 0x52e   : >> { %v4151_v24 = vpop.eup %3069  ;;  %3081 = vpow2.f32 %v1715_v18 }
 0x52f   : >> { %4599 = vst [vmem:[#allocation27_spill] sm:$0xff] %v4151_v24  ;;  %v4153_v33 = vpop.eup %3071  ;;  %3083 = vpow2.f32 %v1717_v20  ;;  %v1541_v5 = vpop.xlane.xlu0 %1540 }
 0x530   : >> { %4600 = vst [vmem:[#allocation28_spill] sm:$0xff] %v4153_v33  ;;  %v4155_v41 = vpop.eup %3073  ;;  %v1615_v60 = vsub.f32 %v4602_v29, %v1541_v5  ;;  %v1616_v52 = vsub.f32 %v4603_v9, %v1541_v5  ;;  %v1815_v1 = vadd.f32 %v4153_v33, %v4151_v24  ;;  %v4609_v24 = vld [vmem:[#allocation36_spill] sm:$0xff] }
 0x531   : >> { %4601 = vst [vmem:[#allocation29_spill] sm:$0xff] %v4155_v41  ;;  %v4161_v53 = vpop.eup %3075  ;;  %v1544_v58 = vpop.xlane.xlu1 %1543 }
 0x532   : >> { %4604 = vst [vmem:[#allocation30_spill] sm:$0xff] %v4161_v53  ;;  %v1719_v14 = vmul.f32 1.442695, %v1615_v60  ;;  %v1721_v16 = vmul.f32 1.442695, %v1616_v52  ;;  %v1617_v18 = vsub.f32 %v4605_v25, %v1544_v58  ;;  %v1618_v51 = vsub.f32 %v4606_v26, %v1544_v58  ;;  %1816 = vadd.xlane.f32.xlu0 %v1815_v1  ;;  %v4607_v25 = vld [vmem:[#allocation34_spill] sm:$0xff] }
 0x533   : >> { %v1818_v20 = vadd.f32 %v4161_v53, %v4155_v41  ;;  %v4608_v1 = vld [vmem:[#allocation35_spill] sm:$0xff]  ;;  %v4610_v41 = vld [vmem:[#allocation37_spill] sm:$0xff] }
 0x534   : >> { %3085 = vpow2.f32 %v1719_v14  ;;  %v1723_v29 = vmul.f32 1.442695, %v1617_v18  ;;  %v1725_v12 = vmul.f32 1.442695, %v1618_v51 }
 0x535   : >> { %3087 = vpow2.f32 %v1721_v16  ;;  %1819 = vadd.xlane.f32.xlu1 %v1818_v20 }
 0x536   : >> { %v4167_v5 = vpop.eup %3077  ;;  %3089 = vpow2.f32 %v1723_v29 }
 0x537   : >> { %v4169_v9 = vpop.eup %3079  ;;  %3091 = vpow2.f32 %v1725_v12  ;;  %v1547_v60 = vpop.xlane.xlu0 %1546 }
 0x538   : >> { %v4171_v52 = vpop.eup %3081  ;;  %v1619_v26 = vsub.f32 %v4607_v25, %v1547_v60  ;;  %v1620_v58 = vsub.f32 %v4608_v1, %v1547_v60  ;;  %v1821_v14 = vadd.f32 %v4169_v9, %v4167_v5 }
 0x539   : >> { %v4177_v18 = vpop.eup %3083  ;;  %v1550_v51 = vpop.xlane.xlu1 %1549 }
 0x53a   : >> { %v1727_v16 = vmul.f32 1.442695, %v1619_v26  ;;  %v1729_v20 = vmul.f32 1.442695, %v1620_v58  ;;  %v1621_v29 = vsub.f32 %v4609_v24, %v1550_v51  ;;  %v1622_v53 = vsub.f32 %v4610_v41, %v1550_v51  ;;  %1822 = vadd.xlane.f32.xlu0 %v1821_v14 }
 0x53b   : >> { %v1824_v12 = vadd.f32 %v4177_v18, %v4171_v52 }
 0x53c   : >> { %3093 = vpow2.f32 %v1727_v16  ;;  %v1731_v25 = vmul.f32 1.442695, %v1621_v29  ;;  %v1733_v33 = vmul.f32 1.442695, %v1622_v53 }
 0x53d   : >> { %3095 = vpow2.f32 %v1729_v20  ;;  %1825 = vadd.xlane.f32.xlu1 %v1824_v12 }
 0x53e   : >> { %v4183_v60 = vpop.eup %3085  ;;  %3097 = vpow2.f32 %v1731_v25 }
 0x53f   : >> { %4611 = vst [vmem:[#allocation31_spill] sm:$0xff] %v4183_v60  ;;  %v4185_v1 = vpop.eup %3087  ;;  %3099 = vpow2.f32 %v1733_v33 }
 0x540   : >> { %v4187_v26 = vpop.eup %3089  ;;  %v1827_v24 = vadd.f32 %v4185_v1, %v4183_v60 }
 0x541   : >> { %4612 = vst [vmem:[#allocation32_spill] sm:$0xff] %v4187_v26  ;;  %v4191_v41 = vpop.eup %3091 }
 0x542   : >> { %4613 = vst [vmem:[#allocation33_spill] sm:$0xff] %v4191_v41  ;;  %1828 = vadd.xlane.f32.xlu0 %v1827_v24  ;;  %v1830_v58 = vadd.f32 %v4191_v41, %v4187_v26 }
 0x544   : >> { %1831 = vadd.xlane.f32.xlu1 %v1830_v58 }
 0x546   : >> { %v4195_v53 = vpop.eup %3093 }
 0x547   : >> { %4614 = vst [vmem:[#allocation34_spill] sm:$0xff] %v4195_v53  ;;  %v4197_v14 = vpop.eup %3095 }
 0x548   : >> { %4615 = vst [vmem:[#allocation35_spill] sm:$0xff] %v4197_v14  ;;  %v4199_v51 = vpop.eup %3097  ;;  %v1833_v33 = vadd.f32 %v4197_v14, %v4195_v53 }
 0x549   : >> { %4616 = vst [vmem:[#allocation36_spill] sm:$0xff] %v4199_v51  ;;  %v4203_v16 = vpop.eup %3099 }
 0x54a   : >> { %4617 = vst [vmem:[#allocation37_spill] sm:$0xff] %v4203_v16  ;;  %1834 = vadd.xlane.f32.xlu0 %v1833_v33  ;;  %v1836_v20 = vadd.f32 %v4203_v16, %v4199_v51 }
 0x54c   : >> { %1837 = vadd.xlane.f32.xlu1 %v1836_v20 }
 0x57f   : >> { %v1769_v29 = vpop.xlane.xlu0 %1768 }
 0x580   : >> { %3101 = vrcp.f32 %v1769_v29 }
 0x583   : >> { %v1772_v12 = vpop.xlane.xlu1 %1771  ;;  %v1553_v25 = vpop.xlane.xlu0 %1552 }
 0x584   : >> { %3103 = vrcp.f32 %v1772_v12  ;;  %v1623_v24 = vsub.f32 %v3943_v46, %v1553_v25  ;;  %v1624_v58 = vsub.f32 %v3945_v21, %v1553_v25 }
 0x586   : >> { %v1735_v60 = vmul.f32 1.442695, %v1623_v24  ;;  %v1737_v26 = vmul.f32 1.442695, %v1624_v58 }
 0x587   : >> { %v1775_v41 = vpop.xlane.xlu0 %1774  ;;  %v1556_v53 = vpop.xlane.xlu1 %1555 }
 0x588   : >> { %3105 = vpow2.f32 %v1735_v60  ;;  %v1625_v33 = vsub.f32 %v3947_v0, %v1556_v53  ;;  %v1626_v14 = vsub.f32 %v3951_v28, %v1556_v53 }
 0x589   : >> { %3107 = vpow2.f32 %v1737_v26 }
 0x58a   : >> { %3109 = vrcp.f32 %v1775_v41  ;;  %v1739_v20 = vmul.f32 1.442695, %v1625_v33  ;;  %v1741_v29 = vmul.f32 1.442695, %v1626_v14  ;;  %v3102_v12 = vpop.eup %3101 }
 0x58b   : >> { %v1778_v51 = vpop.xlane.xlu1 %1777  ;;  %v1559_v16 = vpop.xlane.xlu0 %1558  ;;  %v1928_v28 = vmul.f32 %v3102_v12, %v4001_v2  ;;  %v1927_v41 = vmul.f32 %v3102_v12, %v3999_v59 }
 0x58c   : >> { %3111 = vpow2.f32 %v1739_v20  ;;  %v1627_v46 = vsub.f32 %v3955_v32, %v1559_v16  ;;  %v1628_v21 = vsub.f32 %v3957_v8, %v1559_v16 }
 0x58d   : >> { %3113 = vpow2.f32 %v1741_v29 }
 0x58e   : >> { %v3104_v25 = vpop.eup %3103  ;;  %3115 = vrcp.f32 %v1778_v51  ;;  %v1743_v60 = vmul.f32 1.442695, %v1627_v46  ;;  %v1745_v24 = vmul.f32 1.442695, %v1628_v21 }
 0x58f   : >> { %v1781_v0 = vpop.xlane.xlu0 %1780  ;;  %v1562_v58 = vpop.xlane.xlu1 %1561  ;;  %v1930_v26 = vmul.f32 %v3104_v25, %v4011_v35  ;;  %v1929_v53 = vmul.f32 %v3104_v25, %v4007_v47 }
 0x590   : >> { %3117 = vpow2.f32 %v1743_v60  ;;  %v1629_v32 = vsub.f32 %v3959_v37, %v1562_v58  ;;  %v1630_v8 = vsub.f32 %v3963_v39, %v1562_v58 }
 0x591   : >> { %3119 = vpow2.f32 %v1745_v24  ;;  %v1992_v14 = vpack.c.bf16 %v1930_v26, %v1928_v28  ;;  %v1991_v51 = vpack.c.bf16 %v1929_v53, %v1927_v41 }
 0x592   : >> { %v4219_v16 = vpop.eup %3105  ;;  %3121 = vrcp.f32 %v1781_v0  ;;  %v1747_v33 = vmul.f32 1.442695, %v1629_v32  ;;  %v1749_v20 = vmul.f32 1.442695, %v1630_v8 }
 0x593   : >> { %v4221_v2 = vpop.eup %3107  ;;  %2023 = vmatprep.subr.bf16.mxu1 %v1992_v14  ;;  %v1784_v35 = vpop.xlane.xlu1 %1783 }
 0x594   : >> { %v1565_v59 = vpop.xlane.xlu0 %1564  ;;  %v3110_v29 = vpop.eup %3109  ;;  %3123 = vpow2.f32 %v1747_v33  ;;  %2024 = vmatpush1.bf16.xpose.msra.mxu1 %v1991_v51  ;;  %v1839_v39 = vadd.f32 %v4221_v2, %v4219_v16 }
 0x595   : >> { %v1631_v47 = vsub.f32 %v3967_v23, %v1565_v59  ;;  %v1632_v37 = vsub.f32 %v3969_v42, %v1565_v59  ;;  %3125 = vpow2.f32 %v1749_v20  ;;  %v1932_v0 = vmul.f32 %v3110_v29, %v4020_v31 }
 0x596   : >> { %v4227_v12 = vpop.eup %3111  ;;  %3127 = vrcp.f32 %v1784_v35  ;;  %1840 = vadd.xlane.f32.xlu0 %v1839_v39  ;;  %v1931_v41 = vmul.f32 %v3110_v29, %v4015_v22 }
 0x597   : >> { %v1751_v46 = vmul.f32 1.442695, %v1631_v47  ;;  %v1753_v21 = vmul.f32 1.442695, %v1632_v37  ;;  %v4229_v25 = vpop.eup %3113  ;;  %v1568_v24 = vpop.xlane.xlu1 %1567 }
 0x598   : >> { %v1787_v60 = vpop.xlane.xlu0 %1786  ;;  %v3116_v23 = vpop.eup %3115  ;;  %v1633_v42 = vsub.f32 %v3971_v45, %v1568_v24  ;;  %v1634_v58 = vsub.f32 %v3975_v61, %v1568_v24  ;;  %v1842_v28 = vadd.f32 %v4229_v25, %v4227_v12 }
 0x599   : >> { %3129 = vpow2.f32 %v1751_v46  ;;  %v1934_v26 = vmul.f32 %v3116_v23, %v4033_v36  ;;  %v1933_v53 = vmul.f32 %v3116_v23, %v4026_v55 }
 0x59a   : >> { %3131 = vpow2.f32 %v1753_v21  ;;  %v4239_v32 = vpop.eup %3117  ;;  %v1755_v8 = vmul.f32 1.442695, %v1633_v42  ;;  %v1757_v31 = vmul.f32 1.442695, %v1634_v58  ;;  %1843 = vadd.xlane.f32.xlu1 %v1842_v28 }
 0x59b   : >> { %v4241_v14 = vpop.eup %3119  ;;  %3133 = vrcp.f32 %v1787_v60  ;;  %v1994_v45 = vpack.c.bf16 %v1934_v26, %v1932_v0  ;;  %v1790_v61 = vpop.xlane.xlu1 %1789  ;;  %v1993_v33 = vpack.c.bf16 %v1933_v53, %v1931_v41 }
 0x59c   : >> { %v1571_v51 = vpop.xlane.xlu0 %1570  ;;  %v3122_v20 = vpop.eup %3121  ;;  %3135 = vpow2.f32 %v1755_v8  ;;  %v1845_v55 = vadd.f32 %v4241_v14, %v4239_v32 }
 0x59d   : >> { %v1635_v36 = vsub.f32 %v3979_v19, %v1571_v51  ;;  %v1636_v22 = vsub.f32 %v3981_v13, %v1571_v51  ;;  %3137 = vpow2.f32 %v1757_v31  ;;  %2025 = vmatprep.subr.bf16.mxu1 %v1994_v45  ;;  %v1936_v39 = vmul.f32 %v3122_v20, %v4042_v44 }
 0x59e   : >> { %v4247_v35 = vpop.eup %3123  ;;  %3139 = vrcp.f32 %v1790_v61  ;;  %2026 = vmatpush1.bf16.xpose.msra.mxu1 %v1993_v33  ;;  %1846 = vadd.xlane.f32.xlu0 %v1845_v55  ;;  %v1935_v0 = vmul.f32 %v3122_v20, %v4037_v10 }
 0x59f   : >> { %v1759_v59 = vmul.f32 1.442695, %v1635_v36  ;;  %v1761_v29 = vmul.f32 1.442695, %v1636_v22  ;;  %v4249_v47 = vpop.eup %3125  ;;  %v1574_v37 = vpop.xlane.xlu1 %1573 }
 0x5a0   : >> { %v3128_v19 = vpop.eup %3127  ;;  %v1793_v13 = vpop.xlane.xlu0 %1792  ;;  %v1637_v46 = vsub.f32 %v3983_v4, %v1574_v37  ;;  %v1638_v21 = vsub.f32 %v3987_v7, %v1574_v37  ;;  %v1848_v60 = vadd.f32 %v4249_v47, %v4247_v35 }
 0x5a1   : >> { %3141 = vpow2.f32 %v1759_v59  ;;  %v1938_v24 = vmul.f32 %v3128_v19, %v4050_v34  ;;  %v1937_v23 = vmul.f32 %v3128_v19, %v4044_v27 }
 0x5a2   : >> { %3143 = vpow2.f32 %v1761_v29  ;;  %v1763_v44 = vmul.f32 1.442695, %v1637_v46  ;;  %v1765_v58 = vmul.f32 1.442695, %v1638_v21  ;;  %1849 = vadd.xlane.f32.xlu1 %v1848_v60 }
 0x5a3   : >> { %v4259_v42 = vpop.eup %3129  ;;  %3145 = vrcp.f32 %v1793_v13  ;;  %v1996_v4 = vpack.c.bf16 %v1938_v24, %v1936_v39  ;;  %v1796_v7 = vpop.xlane.xlu1 %1795  ;;  %v1995_v26 = vpack.c.bf16 %v1937_v23, %v1935_v0 }
 0x5a4   : >> { %v4261_v28 = vpop.eup %3131  ;;  %3147 = vpow2.f32 %v1763_v44 }
 0x5a5   : >> { %v1851_v41 = vadd.f32 %v4261_v28, %v4259_v42  ;;  %v3134_v34 = vpop.eup %3133  ;;  %3149 = vpow2.f32 %v1765_v58  ;;  %2027 = vmatprep.subr.bf16.mxu1 %v1996_v4 }
 0x5a6   : >> { %v4265_v10 = vpop.eup %3135  ;;  %3151 = vrcp.f32 %v1796_v7  ;;  %2028 = vmatpush1.bf16.xpose.msra.mxu1 %v1995_v26  ;;  %v1940_v45 = vmul.f32 %v3134_v34, %v4064_v48  ;;  %v1939_v51 = vmul.f32 %v3134_v34, %v4059_v43 }
 0x5a7   : >> { %1852 = vadd.xlane.f32.xlu0 %v1851_v41  ;;  %v4267_v27 = vpop.eup %3137  ;;  %v1799_v53 = vpop.xlane.xlu0 %1798 }
 0x5a8   : >> { %v3140_v8 = vpop.eup %3139  ;;  %v1854_v31 = vadd.f32 %v4267_v27, %v4265_v10  ;;  %3153 = vrcp.f32 %v1799_v53 }
 0x5a9   : >> { %v1942_v61 = vmul.f32 %v3140_v8, %v4072_v15  ;;  %v1941_v33 = vmul.f32 %v3140_v8, %v4066_v38 }
 0x5aa   : >> { %1855 = vadd.xlane.f32.xlu1 %v1854_v31  ;;  %v1802_v36 = vpop.xlane.xlu1 %1801 }
 0x5ab   : >> { %v4275_v20 = vpop.eup %3141  ;;  %3155 = vrcp.f32 %v1802_v36  ;;  %v1998_v55 = vpack.c.bf16 %v1942_v61, %v1940_v45  ;;  %v1997_v59 = vpack.c.bf16 %v1941_v33, %v1939_v51 }
 0x5ac   : >> { %v4277_v22 = vpop.eup %3143 }
 0x5ad   : >> { %v1857_v29 = vadd.f32 %v4277_v22, %v4275_v20  ;;  %v3146_v48 = vpop.eup %3145  ;;  %2029 = vmatprep.subr.bf16.mxu1 %v1998_v55 }
 0x5ae   : >> { %v4281_v37 = vpop.eup %3147  ;;  %2030 = vmatpush1.bf16.xpose.msra.mxu1 %v1997_v59  ;;  %v1944_v19 = vmul.f32 %v3146_v48, %v4086_v56  ;;  %v1943_v46 = vmul.f32 %v3146_v48, %v4081_v40  ;;  %v4619_v59 = vld [vmem:[#allocation38_spill] sm:$0xff] }
 0x5af   : >> { %1858 = vadd.xlane.f32.xlu0 %v1857_v29  ;;  %v4283_v43 = vpop.eup %3149  ;;  %v1805_v38 = vpop.xlane.xlu0 %1804 }
 0x5b0   : >> { %v3152_v15 = vpop.eup %3151  ;;  %v1860_v39 = vadd.f32 %v4283_v43, %v4281_v37  ;;  %3157 = vrcp.f32 %v1805_v38 }
 0x5b1   : >> { %v1946_v13 = vmul.f32 %v3152_v15, %v4094_v17  ;;  %v1945_v21 = vmul.f32 %v3152_v15, %v4088_v49 }
 0x5b2   : >> { %1861 = vadd.xlane.f32.xlu1 %v1860_v39  ;;  %v1808_v60 = vpop.xlane.xlu1 %1807  ;;  %v3154_v24 = vpop.eup %3153 }
 0x5b3   : >> { %3159 = vrcp.f32 %v1808_v60  ;;  %v2000_v0 = vpack.c.bf16 %v1946_v13, %v1944_v19  ;;  %v1999_v23 = vpack.c.bf16 %v1945_v21, %v1943_v46  ;;  %v1948_v58 = vmul.f32 %v3154_v24, %v4105_v11  ;;  %v4622_v13 = vld [vmem:[#allocation30_spill] sm:$0xff] }
 0x5b4   : >> { %v1947_v49 = vmul.f32 %v3154_v24, %v4103_v62  ;;  %v4623_v24 = vld [vmem:[#allocation29_spill] sm:$0xff] }
 0x5b5   : >> { %v3156_v44 = vpop.eup %3155  ;;  %2031 = vmatprep.subr.bf16.mxu1 %v2000_v0 }
 0x5b6   : >> { %2032 = vmatpush1.bf16.xpose.msra.mxu1 %v1999_v23  ;;  %v1950_v56 = vmul.f32 %v3156_v44, %v4113_v54  ;;  %v1949_v17 = vmul.f32 %v3156_v44, %v4107_v3  ;;  %v1212_v44 = vld [vmem:[%s1210_s30 + $0x8] sm:$0xff] }
 0x5b7   : >> { %v1811_v4 = vpop.xlane.xlu0 %1810 }
 0x5b8   : >> { %v2002_v7 = vpack.c.bf16 %v1950_v56, %v1948_v58  ;;  %3161 = vrcp.f32 %v1811_v4  ;;  %v2001_v41 = vpack.c.bf16 %v1949_v17, %v1947_v49  ;;  %v4624_v58 = vld [vmem:[#allocation27_spill] sm:$0xff]  ;;  %v1214_v4 = vpack.c.bf16 %v1212_v44, %v1212_v44 }
 0x5ba   : >> { %2033 = vmatprep.subr.bf16.mxu1 %v2002_v7  ;;  %v1814_v40 = vpop.xlane.xlu1 %1813  ;;  %v3158_v26 = vpop.eup %3157  ;;  %2055 = vmatprep.mubr.bf16.mxu1 %v1214_v4 }
 0x5bb   : >> { %3163 = vrcp.f32 %v1814_v40  ;;  %v1952_v53 = vmul.f32 %v3158_v26, %v4121_v57  ;;  %v1951_v45 = vmul.f32 %v3158_v26, %v4119_v6  ;;  %v4618_v57 = vld [vmem:[#allocation26_spill] sm:$0xff]  ;;  %v4620_v6 = vld [vmem:[#allocation25_spill] sm:$0xff] }
 0x5bd   : >> { %v3160_v34 = vpop.eup %3159 }
 0x5be   : >> { %2034 = vmatpush1.bf16.xpose.msra.mxu1 %v2001_v41  ;;  %v1954_v11 = vmul.f32 %v3160_v34, %v4129_v63  ;;  %v1953_v31 = vmul.f32 %v3160_v34, %v4123_v30 }
 0x5bf   : >> { %v1817_v54 = vpop.xlane.xlu0 %1816 }
 0x5c0   : >> { %v2004_v8 = vpack.c.bf16 %v1954_v11, %v1952_v53  ;;  %3165 = vrcp.f32 %v1817_v54  ;;  %v2003_v61 = vpack.c.bf16 %v1953_v31, %v1951_v45 }
 0x5c2   : >> { %2035 = vmatprep.subr.bf16.mxu1 %v2004_v8  ;;  %v1820_v3 = vpop.xlane.xlu1 %1819  ;;  %v3162_v62 = vpop.eup %3161 }
 0x5c3   : >> { %3167 = vrcp.f32 %v1820_v3  ;;  %v1956_v33 = vmul.f32 %v3162_v62, %v4137_v50  ;;  %v1955_v48 = vmul.f32 %v3162_v62, %v4620_v6  ;;  %v4621_v50 = vld [vmem:[#allocation28_spill] sm:$0xff]  ;;  %v4625_v62 = vld [vmem:[#allocation33_spill] sm:$0xff] }
 0x5c4   : >> { %v4630_v6 = vld [vmem:[#allocation36_spill] sm:$0xff] }
 0x5c5   : >> { %v3164_v51 = vpop.eup %3163 }
 0x5c6   : >> { %2036 = vmatpush1.bf16.xpose.msra.mxu1 %v2003_v61  ;;  %v1958_v36 = vmul.f32 %v3164_v51, %v4618_v57  ;;  %v1957_v30 = vmul.f32 %v3164_v51, %v4619_v59  ;;  %v4627_v57 = vld [vmem:[#allocation31_spill] sm:$0xff] }
 0x5c7   : >> { %v1823_v63 = vpop.xlane.xlu0 %1822 }
 0x5c8   : >> { %v2006_v55 = vpack.c.bf16 %v1958_v36, %v1956_v33  ;;  %3169 = vrcp.f32 %v1823_v63  ;;  %v2005_v15 = vpack.c.bf16 %v1957_v30, %v1955_v48  ;;  %v4629_v30 = vld [vmem:[#allocation37_spill] sm:$0xff]  ;;  %v4631_v48 = vld [vmem:[#allocation34_spill] sm:$0xff] }
 0x5ca   : >> { %2037 = vmatprep.subr.bf16.mxu1 %v2006_v55  ;;  %v1826_v29 = vpop.xlane.xlu1 %1825  ;;  %v3166_v38 = vpop.eup %3165  ;;  %v4628_v55 = vld [vmem:[#allocation35_spill] sm:$0xff] }
 0x5cb   : >> { %3171 = vrcp.f32 %v1826_v29  ;;  %v1960_v19 = vmul.f32 %v3166_v38, %v4621_v50  ;;  %v1959_v56 = vmul.f32 %v3166_v38, %v4624_v58 }
 0x5cd   : >> { %v3168_v39 = vpop.eup %3167 }
 0x5ce   : >> { %2038 = vmatpush1.bf16.xpose.msra.mxu1 %v2005_v15  ;;  %v1962_v46 = vmul.f32 %v3168_v39, %v4622_v13  ;;  %v1961_v0 = vmul.f32 %v3168_v39, %v4623_v24 }
 0x5cf   : >> { %v1829_v21 = vpop.xlane.xlu0 %1828 }
 0x5d0   : >> { %3173 = vrcp.f32 %v1829_v21  ;;  %v2008_v60 = vpack.c.bf16 %v1962_v46, %v1960_v19  ;;  %v2007_v17 = vpack.c.bf16 %v1961_v0, %v1959_v56 }
 0x5d1   : >> { %v1832_v23 = vpop.xlane.xlu1 %1831 }
 0x5d2   : >> { %2039 = vmatprep.subr.bf16.mxu1 %v2008_v60  ;;  %3175 = vrcp.f32 %v1832_v23  ;;  %v3170_v7 = vpop.eup %3169 }
 0x5d3   : >> { %v1964_v49 = vmul.f32 %v3170_v7, %v4169_v9  ;;  %v1963_v8 = vmul.f32 %v3170_v7, %v4167_v5 }
 0x5d5   : >> { %v3172_v40 = vpop.eup %3171 }
 0x5d6   : >> { %2040 = vmatpush1.bf16.xpose.msra.mxu1 %v2007_v17  ;;  %v1966_v26 = vmul.f32 %v3172_v40, %v4177_v18  ;;  %v1965_v53 = vmul.f32 %v3172_v40, %v4171_v52  ;;  %v4626_v18 = vld [vmem:[#allocation32_spill] sm:$0xff] }
 0x5d7   : >> { %v1835_v41 = vpop.xlane.xlu0 %1834 }
 0x5d8   : >> { %3177 = vrcp.f32 %v1835_v41  ;;  %v2010_v34 = vpack.c.bf16 %v1966_v26, %v1964_v49  ;;  %v2009_v3 = vpack.c.bf16 %v1965_v53, %v1963_v8 }
 0x5d9   : >> { %v1838_v11 = vpop.xlane.xlu1 %1837 }
 0x5da   : >> { %v3174_v54 = vpop.eup %3173  ;;  %2041 = vmatprep.subr.bf16.mxu1 %v2010_v34  ;;  %3179 = vrcp.f32 %v1838_v11 }
 0x5db   : >> { %v1968_v45 = vmul.f32 %v3174_v54, %v4185_v1  ;;  %v1967_v52 = vmul.f32 %v3174_v54, %v4627_v57  ;;  %v4633_v57 = vmov (%p968_p11), 0  }
 0x5dc   : >> { %v3176_v31 = vpop.eup %3175  ;;  %3197 = vset.pattern.permute.xlu0 (%p968_p11), %v4633_v57  ;;  %3198 = vset.pattern.permute.xlu1 (%p968_p11), %v4633_v57 }
 0x5dd   : >> { %v1970_v61 = vmul.f32 %v3176_v31, %v4625_v62  ;;  %v1969_v51 = vmul.f32 %v3176_v31, %v4626_v18 }
 0x5de   : >> { %2042 = vmatpush1.bf16.xpose.msra.mxu1 %v2009_v3 }
 0x5df   : >> { %v2012_v9 = vpack.c.bf16 %v1970_v61, %v1968_v45  ;;  %v2011_v63 = vpack.c.bf16 %v1969_v51, %v1967_v52 }
 0x5e1   : >> { %2043 = vmatprep.subr.bf16.mxu1 %v2012_v9 }
 0x5e2   : >> { %v3178_v33 = vpop.eup %3177 }
 0x5e3   : >> { %v1972_v59 = vmul.f32 %v3178_v33, %v4628_v55  ;;  %v1971_v38 = vmul.f32 %v3178_v33, %v4631_v48  ;;  %v4632_v33 = vmov (%p968_p11), 0.0   ;;  %v2082_v48 = vld [vmem:[%s4479_s8 + $0x10] sm:$0xff] (%p968_p11) }
 0x5e4   : >> { %v3180_v36 = vpop.eup %3179  ;;  %2180 = vmatprep.mubr.f32.mxu0 (%p968_p11), %v4632_v33  ;;  %2096 = vperm.xlu1 (%p968_p11), %3198, %v2082_v48  }
 0x5e5   : >> { %v1974_v5 = vmul.f32 %v3180_v36, %v4629_v30  ;;  %v1973_v1 = vmul.f32 %v3180_v36, %v4630_v6 }
 0x5e6   : >> { %2044 = vmatpush1.bf16.xpose.msra.mxu1 %v2011_v63 }
 0x5e7   : >> { %v2014_v29 = vpack.c.bf16 %v1974_v5, %v1972_v59  ;;  %v2013_v15 = vpack.c.bf16 %v1973_v1, %v1971_v38  ;;  %v2080_v1 = vld [vmem:[%s4479_s8] sm:$0xff] (%p968_p11)  ;;  %v2081_v38 = vld [vmem:[%s4479_s8 + $0x8] sm:$0xff] (%p968_p11) }
 0x5e8   : > { %2086 = vperm.xlu0 (%p968_p11), %3197, %v2080_v1  }
 0x5e9   : >> { %2045 = vmatprep.subr.bf16.mxu1 %v2014_v29 }
 0x5ec   : > { %2091 = vperm.xlu0 (%p968_p11), %3197, %v2081_v38  }
 0x5ee   : >> { %2046 = vmatpush1.bf16.xpose.msra.mxu1 %v2013_v15  ;;  %v2083_v15 = vld [vmem:[%s4479_s8 + $0x18] sm:$0xff] (%p968_p11) }
 0x5ef   : > { %2101 = vperm.xlu1 (%p968_p11), %3198, %v2083_v15  }
 0x623   : >> { %v1841_v39 = vpop.xlane.xlu0 %1840 }
 0x624   : >> { %3181 = vrcp.f32 %v1841_v39  ;;  %v2068_v39 = vld [vmem:[%s4478_s7] sm:$0xff] (%p968_p11) }
 0x627   : >> { %v1844_v50 = vpop.xlane.xlu1 %1843 }
 0x628   : >> { %3183 = vrcp.f32 %v1844_v50  ;;  %v2414_v50 = vld [vmem:[%s4480_s9] sm:$0xff] (%p968_p11) }
 0x629   : > { %2420 = vperm.xlu0 (%p968_p11), %3197, %v2414_v50  }
 0x62b   : >> { %v1847_v19 = vpop.xlane.xlu0 %1846 }
 0x62c   : >> { %3185 = vrcp.f32 %v1847_v19  ;;  %v2415_v19 = vld [vmem:[%s4480_s9 + $0x8] sm:$0xff] (%p968_p11) }
 0x62d   : > { %2425 = vperm.xlu1 (%p968_p11), %3198, %v2415_v19  }
 0x62e   : >> { %v3182_v46 = vpop.eup %3181 }
 0x62f   : >> { %v1850_v13 = vpop.xlane.xlu1 %1849  ;;  %v1976_v24 = vmul.f32 %v3182_v46, %v4221_v2  ;;  %v1975_v23 = vmul.f32 %v3182_v46, %v4219_v16  ;;  %v2416_v46 = vld [vmem:[%s4480_s9 + $0x10] sm:$0xff] (%p968_p11) }
 0x630   : >> { %3187 = vrcp.f32 %v1850_v13  ;;  %v2069_v13 = vld [vmem:[%s4478_s7 + $0x8] sm:$0xff] (%p968_p11)  ;;  %2430 = vperm.xlu0 (%p968_p11), %3197, %v2416_v46  }
 0x632   : >> { %v3184_v21 = vpop.eup %3183 }
 0x633   : >> { %v1978_v0 = vmul.f32 %v3184_v21, %v4229_v25  ;;  %v1977_v44 = vmul.f32 %v3184_v21, %v4227_v12  ;;  %v2417_v21 = vld [vmem:[%s4480_s9 + $0x18] sm:$0xff] (%p968_p11) }
 0x634   : >> { %v1853_v60 = vpop.xlane.xlu0 %1852  ;;  %2435 = vperm.xlu1 (%p968_p11), %3198, %v2417_v21  }
 0x635   : >> { %v2016_v58 = vpack.c.bf16 %v1978_v0, %v1976_v24  ;;  %v2015_v56 = vpack.c.bf16 %v1977_v44, %v1975_v23  ;;  %3189 = vrcp.f32 %v1853_v60  ;;  %v2070_v60 = vld [vmem:[%s4478_s7 + $0x10] sm:$0xff] (%p968_p11)  ;;  %v2446_v24 = vld [vmem:[%s4481_s10] sm:$0xff] (%p968_p11)  ;;  %v2447_v0 = vld [vmem:[%s4481_s10 + $0x8] sm:$0xff] (%p968_p11) }
 0x636   : >> { %v3186_v7 = vpop.eup %3185  ;;  %v2071_v23 = vld [vmem:[%s4478_s7 + $0x18] sm:$0xff] (%p968_p11)  ;;  %2452 = vperm.xlu0 (%p968_p11), %3197, %v2446_v24   ;;  %v2448_v44 = vld [vmem:[%s4481_s10 + $0x10] sm:$0xff] (%p968_p11) }
 0x637   : >> { %2047 = vmatprep.subr.bf16.mxu1 %v2016_v58  ;;  %v1856_v4 = vpop.xlane.xlu1 %1855  ;;  %v1980_v49 = vmul.f32 %v3186_v7, %v4241_v14  ;;  %v1979_v25 = vmul.f32 %v3186_v7, %v4239_v32  ;;  %v2449_v58 = vld [vmem:[%s4481_s10 + $0x18] sm:$0xff] (%p968_p11) }
 0x638   : >> { %3191 = vrcp.f32 %v1856_v4  ;;  %2048 = vmatpush1.bf16.xpose.msra.mxu1 %v2015_v56  ;;  %2457 = vperm.xlu1 (%p968_p11), %3198, %v2447_v0  }
 0x63a   : >> { %v3188_v17 = vpop.eup %3187  ;;  %2462 = vperm.xlu0 (%p968_p11), %3197, %v2448_v44  }
 0x63b   : >> { %v1982_v2 = vmul.f32 %v3188_v17, %v4249_v47  ;;  %v1981_v16 = vmul.f32 %v3188_v17, %v4247_v35 }
 0x63c   : >> { %v1859_v40 = vpop.xlane.xlu0 %1858  ;;  %2467 = vperm.xlu1 (%p968_p11), %3198, %v2449_v58  }
 0x63d   : >> { %v2018_v26 = vpack.c.bf16 %v1982_v2, %v1980_v49  ;;  %v2017_v12 = vpack.c.bf16 %v1981_v16, %v1979_v25  ;;  %3193 = vrcp.f32 %v1859_v40  ;;  %v2207_v2 = vld [vmem:[#allocation2 + $0x90] sm:$0xff] (%p968_p11) }
 0x63f   : >> { %2049 = vmatprep.subr.bf16.mxu1 %v2018_v26  ;;  %v1862_v41 = vpop.xlane.xlu1 %1861  ;;  %v3190_v34 = vpop.eup %3189 }
 0x640   : >> { %3195 = vrcp.f32 %v1862_v41  ;;  %2050 = vmatpush1.bf16.xpose.msra.mxu1 %v2017_v12  ;;  %v1984_v11 = vmul.f32 %v3190_v34, %v4261_v28  ;;  %v1983_v14 = vmul.f32 %v3190_v34, %v4259_v42  ;;  %v2206_v12 = vld [vmem:[#allocation2 + $0x88] sm:$0xff] (%p968_p11)  ;;  %v2208_v41 = vld [vmem:[#allocation2 + $0x98] sm:$0xff] (%p968_p11) }
 0x642   : >> { %v3192_v53 = vpop.eup %3191 }
 0x643   : >> { %v1986_v54 = vmul.f32 %v3192_v53, %v4267_v27  ;;  %v1985_v32 = vmul.f32 %v3192_v53, %v4265_v10  ;;  %v1211_v10 = vld [vmem:[%s1210_s30] sm:$0xff] }
 0x644   : >> { %v1213_v61 = vpack.c.bf16 %v1211_v10, %v1211_v10  ;;  %v2205_v53 = vld [vmem:[#allocation2 + $0x80] sm:$0xff] (%p968_p11)  ;;  %v2210_v10 = vld [vmem:[#allocation2 + $0xa8] sm:$0xff] (%p968_p11) }
 0x645   : >> { %v2020_v47 = vpack.c.bf16 %v1986_v54, %v1984_v11  ;;  %v2019_v35 = vpack.c.bf16 %v1985_v32, %v1983_v14 }
 0x647   : >> { %2051 = vmatprep.subr.bf16.mxu1 %v2020_v47  ;;  %v3194_v8 = vpop.eup %3193 }
 0x648   : >> { %2052 = vmatpush1.bf16.xpose.msra.mxu1 %v2019_v35  ;;  %v1988_v3 = vmul.f32 %v3194_v8, %v4277_v22  ;;  %v1987_v28 = vmul.f32 %v3194_v8, %v4275_v20 }
 0x64a   : >> { %v3196_v31 = vpop.eup %3195 }
 0x64b   : >> { %v1990_v45 = vmul.f32 %v3196_v31, %v4283_v43  ;;  %v1989_v27 = vmul.f32 %v3196_v31, %v4281_v37 }
 0x64d   : >> { %v2022_v62 = vpack.c.bf16 %v1990_v45, %v1988_v3  ;;  %v2021_v42 = vpack.c.bf16 %v1989_v27, %v1987_v28 }
 0x64f   : >> { %2053 = vmatprep.subr.bf16.mxu1 %v2022_v62  ;;  %v2211_v62 = vld [vmem:[#allocation2 + $0xb0] sm:$0xff] (%p968_p11) }
 0x650   : >> { %2054 = vmatpush1.bf16.xpose.msra.mxu1 %v2021_v42 }
 0x657   : >> { %2056 = vmatmul.mubr.bf16.vlgmr.msra.gmra.mrb[64].mxu1 %v1213_v61 }
 0x658   : > { %2288 = vmatprep.mubr.f32.mxu1 (%p968_p11), %v4632_v33 }
 0x663   : > { %v2097_v34 = vpop.permute.xlu1 (%p968_p11), %2096 }
 0x667   : > { %v2087_v56 = vpop.permute.xlu0 (%p968_p11), %2086 }
 0x66b   : > { %v2092_v17 = vpop.permute.xlu0 (%p968_p11), %2091 }
 0x66e   : > { %v2102_v45 = vpop.permute.xlu1 (%p968_p11), %2101 }
 0x727   : > { %970 = sbr.rel (!%p968_p11) target bundleno = 661 (0x295), region = 111 }
 0x72a   : >> { %v2057_v9 = vpop.f32.mrb[64].mxu1 }
 0x72b   : >> { %2066 = vst [vmem:[%s2065_s15] sm:$0xff] %v2057_v9  ;;  %v2059_v18 = vpop.f32.mrb[65].mxu1 }
 0x72c   : >> { %2067 = vst [vmem:[%s2065_s15 + $0x8] sm:$0xff] %v2059_v18  ;;  %v2061_v22 = vpop.f32.mrb[66].mxu1  ;;  %v2212_v18 = vld [vmem:[#allocation2 + $0xb8] sm:$0xff] (%p968_p11)  ;;  %s2689_s15 = sshll.u32 (%p968_p11), %s3366_s21, 10 }
 0x72d   : >> { %v2062_v43 = vpop.f32.mrb[67].mxu1  ;;  %v2209_v22 = vld [vmem:[#allocation2 + $0xa0] sm:$0xff] (%p968_p11)  ;;  %s4416_s14 = scalar_lea.hbm (%p968_p11), %s4482_s11, %s2689_s15 }
 0x733   : > { %v2073_v20 = vld [vmem:[#allocation3 + $0x8] sm:$0xff]  ;;  %v2075_v37 = vld [vmem:[#allocation3 + $0x18] sm:$0xff]  ;;  %v2072_v51 = vld [vmem:[#allocation3] sm:$0xff] }
 0x734   : > { %v2845_v52 = vpack.c.bf16 %v2075_v37, %v2073_v20  ;;  %v2074_v36 = vld [vmem:[#allocation3 + $0x10] sm:$0xff]  ;;  %v2077_v63 = vld [vmem:[#allocation3 + $0x28] sm:$0xff]  ;;  %v2079_v55 = vld [vmem:[#allocation3 + $0x38] sm:$0xff] }
 0x735   : > { %v2847_v59 = vpack.c.bf16 %v2074_v36, %v2072_v51  ;;  %v2849_v30 = vpack.c.bf16 %v2079_v55, %v2077_v63  ;;  %v2076_v5 = vld [vmem:[#allocation3 + $0x20] sm:$0xff]  ;;  %v2078_v29 = vld [vmem:[#allocation3 + $0x30] sm:$0xff]  ;;  %v3281_v63 = vmov 1.0   ;;  %v2297_v55 = vlaneseq }
 0x736   : > { %2846 = vmatprep.subr.bf16.mxu0 %v2845_v52  ;;  %v2851_v6 = vpack.c.bf16 %v2078_v29, %v2076_v5 }
 0x737   : > { %2848 = vmatpush1.bf16.msra.mxu0 %v2847_v59  ;;  %v2298_v59 = vshrl.u32 %v2297_v55, 7 }
 0x738   : > { %2850 = vmatprep.subr.bf16.mxu0 %v2849_v30 }
 0x739   : > { %v2299_v30 = vsub.s32 0, %v2298_v59 }
 0x73b   : > { %2852 = vmatpush1.bf16.msra.mxu0 %v2851_v6 }
 0x73e   : > { %2674 = vmatmul.mubr.msk.f32.vlgmr.msra.gmra.mrb[0].mxu0 %vm688_vm2, %v2068_v39 }
 0x73f   : > { %2186 = vmatprep.mubr.f32.mxu0 %v4632_v33 }
 0x742   : > { %2675 = vmatmul.mubr.msk.f32.gmra.mrb[2].mxu0 %vm688_vm2, %v2069_v13 }
 0x743   : > { %2192 = vmatprep.mubr.f32.mxu0 %v4632_v33 }
 0x746   : > { %2676 = vmatmul.mubr.msk.f32.gmra.mrb[4].mxu0 %vm688_vm2, %v2070_v60 }
 0x747   : > { %2198 = vmatprep.mubr.f32.mxu0 %v4632_v33 }
 0x74a   : > { %2677 = vmatmul.mubr.msk.f32.gmra.mrb[6].mxu0 %vm688_vm2, %v2071_v23 }
 0x811   : > { %v2182_v4 = vpop.f32.mrb[0].mxu0 }
 0x812   : > { %v2184_v7 = vpop.f32.mrb[1].mxu0  ;;  %v2183_v25 = vadd.f32 %v2182_v4, %v2087_v56 }
 0x813   : > { %v2185_v40 = vadd.f32 %v2184_v7, %v2087_v56 }
 0x814   : > { %v2213_v35 = vadd.f32 %v2205_v53, %v2183_v25 }
 0x815   : > { %v2188_v49 = vpop.f32.mrb[2].mxu0  ;;  %v2214_v32 = vadd.f32 %v2206_v12, %v2185_v40  ;;  %v2421_v12 = vpop.permute.xlu0 %2420 }
 0x816   : > { %v2189_v16 = vadd.f32 %v2188_v49, %v2092_v17  ;;  %v2190_v26 = vpop.f32.mrb[3].mxu0 }
 0x817   : > { %v2191_v11 = vadd.f32 %v2190_v26, %v2092_v17 }
 0x818   : > { %v2215_v54 = vadd.f32 %v2207_v2, %v2189_v16 }
 0x819   : > { %v2194_v14 = vpop.f32.mrb[4].mxu0  ;;  %v2216_v47 = vadd.f32 %v2208_v41, %v2191_v11  ;;  %v2426_v41 = vpop.permute.xlu1 %2425 }
 0x81a   : > { %v2196_v8 = vpop.f32.mrb[5].mxu0  ;;  %v2855_v3 = vpack.c.bf16 %v2215_v54, %v2213_v35  ;;  %v2195_v42 = vadd.f32 %v2194_v14, %v2097_v34  ;;  %v2431_v11 = vpop.permute.xlu0 %2430 }
 0x81b   : > { %v2853_v31 = vpack.c.bf16 %v2216_v47, %v2214_v32  ;;  %v2197_v28 = vadd.f32 %v2196_v8, %v2097_v34 }
 0x81c   : > { %v2217_v57 = vadd.f32 %v2209_v22, %v2195_v42 }
 0x81d   : > { %v2200_v27 = vpop.f32.mrb[6].mxu0  ;;  %2854 = vmatprep.subr.bf16.mxu1 %v2853_v31  ;;  %v2218_v37 = vadd.f32 %v2210_v10, %v2197_v28 }
 0x81e   : > { %v2201_v61 = vadd.f32 %v2200_v27, %v2102_v45  ;;  %v2202_v9 = vpop.f32.mrb[7].mxu0  ;;  %2856 = vmatpush1.bf16.msra.mxu1 %v2855_v3 }
 0x81f   : > { %v2203_v43 = vadd.f32 %v2202_v9, %v2102_v45 }
 0x820   : > { %v2219_v20 = vadd.f32 %v2211_v62, %v2201_v61 }
 0x821   : > { %v2220_v51 = vadd.f32 %v2212_v18, %v2203_v43 }
 0x822   : > { %v2859_v36 = vpack.c.bf16 %v2219_v20, %v2217_v57 }
 0x823   : > { %v2857_v52 = vpack.c.bf16 %v2220_v51, %v2218_v37 }
 0x825   : > { %2858 = vmatprep.subr.bf16.mxu1 %v2857_v52 }
 0x826   : > { %2860 = vmatpush1.bf16.msra.mxu1 %v2859_v36 }
 0x829   : > { %2678 = vmatmul.mubr.msk.f32.vlgmr.msra.gmra.mrb[0].mxu1 %vm688_vm2, %v3281_v63 }
 0x82a   : > { %2385 = vmatprep.mubr.f32.mxu1 %v4632_v33 }
 0x8fc   : > { %v2290_v5 = vpop.f32.mrb[0].mxu1 }
 0x8fd   : > { %v2295_v29 = vmul.f32 0.03125, %v2290_v5  ;;  %v2292_v6 = vpop.f32.mrb[1].mxu1 }
 0x8fe   : > { %v2296_v1 = vmul.f32 0.03125, %v2292_v6 }
 0x8ff   : > { %v2300_v48 = vrot.slane %v2295_v29, %v2299_v30 }
 0x900   : > { %v2304_v38 = vrot.slane %v2296_v1, %v2299_v30 }
 0x901   : > { %v2305_v15 = vsub.f32 %v2213_v35, %v2300_v48  ;;  %v2307_v39 = vsub.f32 %v2215_v54, %v2300_v48  ;;  %v2309_v21 = vsub.f32 %v2217_v57, %v2300_v48  ;;  %v2311_v60 = vsub.f32 %v2219_v20, %v2300_v48  ;;  %v2436_v54 = vpop.permute.xlu1 %2435 }
 0x902   : > { %v2306_v50 = vsub.f32 %v2214_v32, %v2304_v38  ;;  %v2308_v19 = vsub.f32 %v2216_v47, %v2304_v38  ;;  %v2310_v13 = vsub.f32 %v2218_v37, %v2304_v38  ;;  %v2312_v46 = vsub.f32 %v2220_v51, %v2304_v38  ;;  %v2453_v32 = vpop.permute.xlu0 %2452 }
 0x903   : > { %v2313_v24 = vmul.f32 %v2305_v15, %v2305_v15  ;;  %v2315_v0 = vmul.f32 %v2307_v39, %v2307_v39  ;;  %v2317_v7 = vmul.f32 %v2309_v21, %v2309_v21  ;;  %v2319_v17 = vmul.f32 %v2311_v60, %v2311_v60 }
 0x904   : > { %v2314_v33 = vmul.f32 %v2306_v50, %v2306_v50  ;;  %v2316_v23 = vmul.f32 %v2308_v19, %v2308_v19  ;;  %v2318_v44 = vmul.f32 %v2310_v13, %v2310_v13  ;;  %v2320_v58 = vmul.f32 %v2312_v46, %v2312_v46 }
 0x905   : > { %v2863_v4 = vpack.c.bf16 %v2315_v0, %v2313_v24  ;;  %v2867_v49 = vpack.c.bf16 %v2319_v17, %v2317_v7  ;;  %v2458_v47 = vpop.permute.xlu1 %2457 }
 0x906   : > { %v2861_v56 = vpack.c.bf16 %v2316_v23, %v2314_v33  ;;  %v2865_v40 = vpack.c.bf16 %v2320_v58, %v2318_v44  ;;  %v2463_v20 = vpop.permute.xlu0 %2462 }
 0x908   : > { %2862 = vmatprep.subr.bf16.mxu1 %v2861_v56 }
 0x909   : > { %2864 = vmatpush1.bf16.msra.mxu1 %v2863_v4  ;;  %v2468_v37 = vpop.permute.xlu1 %2467 }
 0x90a   : > { %2866 = vmatprep.subr.bf16.mxu1 %v2865_v40 }
 0x90d   : > { %2868 = vmatpush1.bf16.msra.mxu1 %v2867_v49 }
 0x910   : > { %2679 = vmatmul.mubr.msk.f32.vlgmr.msra.gmra.mrb[2].mxu1 %vm688_vm2, %v3281_v63 }
 0x9e3   : > { %v2387_v2 = vpop.f32.mrb[2].mxu1 }
 0x9e4   : > { %v2392_v25 = vmul.f32 0.03125, %v2387_v2  ;;  %v2389_v16 = vpop.f32.mrb[3].mxu1 }
 0x9e5   : > { %v2393_v26 = vmul.f32 0.03125, %v2389_v16 }
 0x9e6   : > { %v2394_v34 = vadd.f32 1e-05, %v2392_v25 }
 0x9e7   : > { %v2395_v53 = vadd.f32 1e-05, %v2393_v26 }
 0x9e8   : > { %3199 = vrsqrt.f32 %v2394_v34 }
 0x9e9   : > { %3201 = vrsqrt.f32 %v2395_v53 }
 0x9f2   : > { %v3200_v14 = vpop.eup %3199 }
 0x9f3   : > { %v3202_v35 = vpop.eup %3201  ;;  %v2401_v8 = vrot.slane %v3200_v14, %v2299_v30 }
 0x9f4   : > { %v2405_v31 = vrot.slane %v3202_v35, %v2299_v30 }
 0x9f5   : > { %v2406_v3 = vmul.f32 %v2401_v8, %v2305_v15  ;;  %v2408_v45 = vmul.f32 %v2401_v8, %v2307_v39  ;;  %v2410_v28 = vmul.f32 %v2401_v8, %v2309_v21  ;;  %v2412_v27 = vmul.f32 %v2401_v8, %v2311_v60 }
 0x9f6   : > { %v2407_v62 = vmul.f32 %v2405_v31, %v2306_v50  ;;  %v2409_v42 = vmul.f32 %v2405_v31, %v2308_v19  ;;  %v2411_v10 = vmul.f32 %v2405_v31, %v2310_v13  ;;  %v2413_v61 = vmul.f32 %v2405_v31, %v2312_v46 }
 0x9f7   : > { %v2438_v9 = vmul.f32 %v2421_v12, %v2406_v3  ;;  %v2440_v18 = vmul.f32 %v2426_v41, %v2408_v45  ;;  %v2442_v22 = vmul.f32 %v2431_v11, %v2410_v28  ;;  %v2444_v43 = vmul.f32 %v2436_v54, %v2412_v27 }
 0x9f8   : > { %v2439_v51 = vmul.f32 %v2421_v12, %v2407_v62  ;;  %v2441_v57 = vmul.f32 %v2426_v41, %v2409_v42  ;;  %v2443_v52 = vmul.f32 %v2431_v11, %v2411_v10  ;;  %v2445_v36 = vmul.f32 %v2436_v54, %v2413_v61 }
 0x9f9   : > { %v2470_v63 = vadd.f32 %v2453_v32, %v2438_v9  ;;  %v2472_v55 = vadd.f32 %v2458_v47, %v2440_v18  ;;  %v2474_v59 = vadd.f32 %v2463_v20, %v2442_v22  ;;  %v2476_v30 = vadd.f32 %v2468_v37, %v2444_v43 }
 0x9fa   : > { %v2471_v5 = vadd.f32 %v2453_v32, %v2439_v51  ;;  %v2473_v29 = vadd.f32 %v2458_v47, %v2441_v57  ;;  %v2475_v6 = vadd.f32 %v2463_v20, %v2443_v52  ;;  %v2477_v1 = vadd.f32 %v2468_v37, %v2445_v36 }
 0x9fb   : > { %2478 = vst [vmem:[%s3674_s19] sm:$0xff] %v2470_v63  ;;  %2480 = vst [vmem:[%s3674_s19 + $0x10] sm:$0xff] %v2472_v55 }
 0x9fc   : > { %2482 = vst [vmem:[%s3674_s19 + $0x20] sm:$0xff] %v2474_v59  ;;  %2484 = vst [vmem:[%s3674_s19 + $0x30] sm:$0xff] %v2476_v30 }
 0x9fd   : > { %2479 = vst [vmem:[%s3674_s19 + $0x8] sm:$0xff] %v2471_v5  ;;  %2481 = vst [vmem:[%s3674_s19 + $0x18] sm:$0xff] %v2473_v29 }
 0x9fe   : > { %2483 = vst [vmem:[%s3674_s19 + $0x28] sm:$0xff] %v2475_v6  ;;  %2485 = vst [vmem:[%s3674_s19 + $0x38] sm:$0xff] %v2477_v1 }
 0x9ff   : > { %3216 = shalt.err (!%p3213_p4)
}
 0xa00   : > { %s3217_s19 = scalar_lea.hbm %s4416_s14, 1024  ;;  %s3221_s21 = scalar_lea.hbm %s4482_s11, 2048 }
 0xa01   : > { %p3218_p7 = scmp.ne.s32.totalorder %s4416_s14, %s3217_s19  ;;  %p3222_p10 = scmp.lt.u32.totalorder %s4416_s14, %s4482_s11 }
 0xa02   : > { %p3223_p11 = scmp.lt.u32.totalorder %s3221_s21, %s3217_s19  ;;  %p3225_p13 = scmp.lt.u32.totalorder %s3217_s19, %s4416_s14 }
 0xa03   : > { %p3219_p8 = pnand %p3218_p7, %p3383_p5 }
 0xa04   : > { %p3224_p12 = por %p3223_p11, %p3222_p10 }
 0xa05   : > { %p3220_p9 = pneg %p3219_p8 }
 0xa06   : > { %p3226_p0 = por %p3225_p13, %p3224_p12 }
 0xa08   : > { %p3227_p1 = pnand %p3226_p0, %p3220_p9 }
 0xa0a   : > { %3230 = shalt.err (!%p3227_p1)
}
 0xa0b   : > { %s3283_s22 = smov 256   ;;  %s3284_s24 = smov 16  }
 0xa0c   : > { %2886 = dma.vmem_to_hbm [thread:$0]  (%p3383_p5), %s4418_s26, 1024, %s4416_s14, %s4430_s16, %s3283_s22, %s3283_s22, %s3284_s24  }
 0xa0d PF: > { %p2892_p2 = scmp.ge.s32.totalorder %s3269_s20, 2  ;;  %s2515_s25 = sand.u32 1, %s3257_s17  }
 0xa0e   : > { %s2516_s12 = scalar_lea.sflag [#allocation5], %s2515_s25 }
 0xa0f   : > { %p2889_p3 = pnand %p2892_p2, %p3387_p6 }
 0xa11   : > { %3252 = dma.done.wait (!%p2889_p3), %s2516_s12, 1024  }
 0xa12   : > { %3254 = vsyncadd (!%p2889_p3), %s2516_s12, 4294966272  ;;  %s4635_s19 = sld [smem:[#allocation7_spill]]  ;;  %s4636_s30 = sld [smem:[#allocation8_spill]] }
 0xa13   : > { %p21_p4 = scmp.ge.s32.totalorder %s3370_s23, 4   ;;  %s4637_s17 = smov %s3261_s18 }
 0xa14   : > { %s4640_s20 = smov %s3370_s23 }
 0xa15   :  { %23 = sbr.rel (!%p21_p4) target bundleno = 3 (0x3), region = 122 }
 0xa18   : > { %s4638_s18 = smov %s4635_s19  ;;  %s4639_s19 = smov %s4636_s30 }
 0xa1c   :  { %2521 = vsyncpa [#allocation5], 1 }
 0xa1d   :  { %2523 = vsyncpa [#allocation5 + $0x1], 1 }

</bundles_post_ra>
